<compile_context>
chip_gen: v7x
topology: tpu7x:2x2x1
jax: 0.10.0
libtpu: 0.0.40
codegen_flags: <defaults>
</compile_context>

<pallas_src>
import functools

import jax
import jax.numpy as jnp
from jax.experimental import pallas as pl
from jax.experimental.pallas import tpu as pltpu


def _round_up(x, m):
    return (x + m - 1) // m * m


def _pick_batch_block(batch, hw, target_m=256):
    """Choose how many samples to fold into one grid step so M = bblk*hw >= target,
    while leaving >1 grid step (TC parallelism) when hw is already large."""
    bblk = max(1, min(batch, -(-target_m // hw)))
    while batch % bblk:
        bblk -= 1
    return bblk


def _im2col(x_nhwc, kh, kw, stride, pad):
    """[B,H,W,C] -> ([B, Hout*Wout, kh*kw*C], Hout, Wout); patch order (i, j, c)."""
    x = jnp.pad(x_nhwc, ((0, 0), (pad, pad), (pad, pad), (0, 0)))
    B, H, W, C = x.shape
    Hout = (H - kh) // stride + 1
    Wout = (W - kw) // stride + 1
    cols = []
    for i in range(kh):
        for j in range(kw):
            cols.append(
                x[:, i:i + (Hout - 1) * stride + 1:stride,
                     j:j + (Wout - 1) * stride + 1:stride, :]
            )
    patches = jnp.concatenate(cols, axis=-1)          # [B, Hout, Wout, kh*kw*C]
    return patches.reshape(B, Hout * Wout, kh * kw * C), Hout, Wout


# ----------------------------- Pallas kernels ------------------------------ #

def _conv_block_kernel(x_ref, w_ref, scale_ref, shift_ref, o_ref, *, do_norm, do_act):
    # x_ref:     (Bblk, HW, Kp)  bf16
    # w_ref:     (Kp, Np)        bf16
    # scale_ref: (1, Np)         f32   (gamma for IN layers; unused otherwise)
    # shift_ref: (1, Np)         f32   (beta for IN layers; conv bias otherwise)
    # o_ref:     (Bblk, HW, Np)  bf16
    bblk, hw, kp = x_ref.shape
    npad = w_ref.shape[1]
    # Fold batch into M for a single large MXU matmul (f32 accumulation).
    lhs = x_ref[...].reshape(bblk * hw, kp)
    y = jnp.dot(lhs, w_ref[...], preferred_element_type=jnp.float32)
    y = y.reshape(bblk, hw, npad)
    if do_norm:
        # InstanceNorm2d (per-sample, per-channel over spatial), eps=1e-5, biased var.
        # One-pass stats; conv bias omitted (cancelled by mean subtraction).
        mean = jnp.mean(y, axis=1, keepdims=True)                  # (Bblk, 1, Np)
        mean_sq = jnp.mean(y * y, axis=1, keepdims=True)
        var = jnp.maximum(mean_sq - mean * mean, 0.0)
        inv = jax.lax.rsqrt(var + 1e-5)
        y = (y - mean) * (inv * scale_ref[...]) + shift_ref[...]
    else:
        y = y + shift_ref[...]                                     # plain conv bias
    if do_act:
        y = jnp.where(y >= 0, y, 0.2 * y)                          # LeakyReLU(0.2)
    o_ref[...] = y.astype(o_ref.dtype)


def _classifier_kernel(x_ref, w1_ref, b1_ref, w2_ref, b2_ref, o_ref):
    # x: (B, F) bf16, w1: (F, H1p) bf16, b1/w2: (1, H1p) f32, b2: (1,1) f32.
    h = jnp.dot(x_ref[...], w1_ref[...], preferred_element_type=jnp.float32) + b1_ref[...]
    h = jnp.where(h >= 0, h, 0.2 * h)                              # LeakyReLU(0.2)
    # Final Linear(H1 -> 1) as a VPU multiply + lane reduction (MXU with N=1 is ~0.5% used).
    o_ref[...] = jnp.sum(h * w2_ref[...], axis=-1, keepdims=True) + b2_ref[...]


# ------------------------------ layer wrappers ----------------------------- #

def conv_block(x_nhwc, w_oihw, bias, gamma, beta, *, stride, pad, do_norm, do_act):
    B = x_nhwc.shape[0]
    cin_eff = x_nhwc.shape[-1]                     # may carry zero-padded channels
    Cout, Cin, kh, kw = w_oihw.shape
    Np = _round_up(Cout, 128)                      # lane-dense output channels

    patches, Hout, Wout = _im2col(x_nhwc.astype(jnp.bfloat16), kh, kw, stride, pad)
    HW = Hout * Wout
    K = kh * kw * cin_eff
    Kp = _round_up(K, 128)
    if Kp != K:
        patches = jnp.pad(patches, ((0, 0), (0, 0), (0, Kp - K)))

    # Weight -> (kh, kw, cin_eff, Cout) flattened to (K, Cout), matching patch (i,j,c)
    # ordering; zero rows for carried padded input channels, zero cols for padded Cout.
    w = w_oihw
    if cin_eff != Cin:
        w = jnp.pad(w, ((0, 0), (0, cin_eff - Cin), (0, 0), (0, 0)))
    wmat = jnp.transpose(w, (2, 3, 1, 0)).reshape(K, Cout)
    wmat = jnp.pad(wmat, ((0, Kp - K), (0, Np - Cout))).astype(jnp.bfloat16)

    if do_norm:
        scale = jnp.pad(gamma, (0, Np - Cout)).reshape(1, Np).astype(jnp.float32)
        shift = jnp.pad(beta, (0, Np - Cout)).reshape(1, Np).astype(jnp.float32)
    else:
        scale = jnp.ones((1, Np), jnp.float32)     # unused when do_norm=False
        shift = jnp.pad(bias, (0, Np - Cout)).reshape(1, Np).astype(jnp.float32)

    Bblk = _pick_batch_block(B, HW)
    grid = (B // Bblk,)

    kernel = functools.partial(_conv_block_kernel, do_norm=do_norm, do_act=do_act)
    out = pl.pallas_call(
        kernel,
        out_shape=jax.ShapeDtypeStruct((B, HW, Np), jnp.bfloat16),
        grid=grid,
        in_specs=[
            pl.BlockSpec((Bblk, HW, Kp), lambda g: (g, 0, 0)),
            pl.BlockSpec((Kp, Np), lambda g: (0, 0)),     # constant index -> revisited
            pl.BlockSpec((1, Np), lambda g: (0, 0)),
            pl.BlockSpec((1, Np), lambda g: (0, 0)),
        ],
        out_specs=pl.BlockSpec((Bblk, HW, Np), lambda g: (g, 0, 0)),
        compiler_params=pltpu.CompilerParams(dimension_semantics=("parallel",)),
    )(patches, wmat, scale, shift)
    return out.reshape(B, Hout, Wout, Np)


def classifier(x_flat_nhwc, fc1_w, fc1_b, fc2_w, fc2_b, *, H, W, C):
    """x_flat_nhwc: (B, H*W*C) flattened in (h, w, c) order; fc1_w is permuted here
    (trace-time) so no activation transpose is needed on the critical path."""
    B, F = x_flat_nhwc.shape
    H1 = fc1_w.shape[0]
    H1p = _round_up(H1, 128)

    # fc1_w columns are in PyTorch NCHW-flatten (c, h, w) order -> reorder to (h, w, c).
    w1 = jnp.transpose(fc1_w.reshape(H1, C, H, W), (2, 3, 1, 0)).reshape(F, H1)
    w1 = jnp.pad(w1, ((0, 0), (0, H1p - H1))).astype(jnp.bfloat16)
    b1 = jnp.pad(fc1_b, (0, H1p - H1)).reshape(1, H1p).astype(jnp.float32)
    w2 = jnp.pad(fc2_w, ((0, 0), (0, H1p - H1))).astype(jnp.float32)      # (1, H1p)
    b2 = fc2_b.reshape(1, 1).astype(jnp.float32)

    return pl.pallas_call(
        _classifier_kernel,
        out_shape=jax.ShapeDtypeStruct((B, 1), jnp.float32),
        grid=(1,),
        in_specs=[
            pl.BlockSpec((B, F), lambda i: (0, 0)),
            pl.BlockSpec((F, H1p), lambda i: (0, 0)),
            pl.BlockSpec((1, H1p), lambda i: (0, 0)),
            pl.BlockSpec((1, H1p), lambda i: (0, 0)),
            pl.BlockSpec((1, 1), lambda i: (0, 0)),
        ],
        out_specs=pl.BlockSpec((B, 1), lambda i: (0, 0)),
        compiler_params=pltpu.CompilerParams(dimension_semantics=("arbitrary",)),
    )(x_flat_nhwc.astype(jnp.bfloat16), w1, b1, w2, b2)


# ------------------------------- model ------------------------------------- #

# (name, stride, pad, has_instance_norm, has_leaky_relu) -- conv0 is 'C' only,
# conv1..5 are 'C' + 'IL'.
_LAYER_CFG = [
    ("conv0", 1, 3, False, False),
    ("conv1", 2, 1, True, True),
    ("conv2", 1, 1, True, True),
    ("conv3", 2, 1, True, True),
    ("conv4", 1, 1, True, True),
    ("conv5", 2, 1, True, True),
]


def discriminator_32_forward(x_nchw, params):
    x = jnp.transpose(x_nchw, (0, 2, 3, 1)).astype(jnp.bfloat16)    # NCHW -> NHWC
    for name, stride, pad, do_norm, do_act in _LAYER_CFG:
        p = params[name]
        x = conv_block(x, p["w"], p["b"], p["gamma"], p["beta"],
                       stride=stride, pad=pad, do_norm=do_norm, do_act=do_act)
    B, H, W, C = x.shape                                            # (B, 4, 4, 256)
    # NHWC flatten; the fc1 weight rows are permuted inside classifier() to match,
    # so PyTorch's view(B, -1)-on-NCHW semantics are preserved with no activation
    # transpose. (Final layer Cout=256 is already a multiple of 128 -> no pad channels.)
    x_flat = x.reshape(B, H * W * C)
    return classifier(x_flat, params["fc1_w"], params["fc1_b"],
                      params["fc2_w"], params["fc2_b"], H=H, W=W, C=C)


def init_params(key, in_nc=3, nc=64):
    convs = [
        ("conv0", in_nc, nc, 7),
        ("conv1", nc, nc, 4),
        ("conv2", nc, nc * 2, 3),
        ("conv3", nc * 2, nc * 2, 4),
        ("conv4", nc * 2, nc * 4, 3),
        ("conv5", nc * 4, nc * 4, 4),
    ]
    params = {}
    for name, cin, cout, k in convs:
        key, k1, k2 = jax.random.split(key, 3)
        fan_in = float(cin * k * k)
        params[name] = {
            "w": jax.random.normal(k1, (cout, cin, k, k), jnp.float32) / jnp.sqrt(fan_in),
            # Conv bias exists in the PyTorch module; for IN layers it is mathematically
            # cancelled by the mean subtraction, so the kernel never adds it.
            "b": jax.random.normal(k2, (cout,), jnp.float32) * 0.01,
            "gamma": jnp.ones((cout,), jnp.float32),   # InstanceNorm2d affine init
            "beta": jnp.zeros((cout,), jnp.float32),
        }
    feat = nc * 4 * 4 * 4                                            # 256*4*4 = 4096
    key, k1, k2, k3, k4 = jax.random.split(key, 5)
    params["fc1_w"] = jax.random.normal(k1, (100, feat), jnp.float32) / jnp.sqrt(float(feat))
    params["fc1_b"] = jax.random.normal(k2, (100,), jnp.float32) * 0.01
    params["fc2_w"] = jax.random.normal(k3, (1, 100), jnp.float32) / 10.0
    params["fc2_b"] = jax.random.normal(k4, (1,), jnp.float32) * 0.01
    return params


if __name__ == "__main__":
    key = jax.random.PRNGKey(0)
    kx, kp = jax.random.split(key)
    # Discriminator_32 requires 32x32 spatial (classifier is Linear(256*4*4, 100)).
    x = jax.random.normal(kx, (2, 3, 32, 32), jnp.float32)
    params = init_params(kp)
    out = jax.block_until_ready(discriminator_32_forward(x, params))
    assert out.shape == (2, 1), out.shape
    print("KERNEL_OK")
</pallas_src>

<mosaic_0001>
module attributes {stable_mosaic.version = 11 : i64} {
  func.func @_conv_block_kernel(%arg0: i32, %arg1: memref<1x1024x256xbf16, #tpu.memory_space<vmem>>, %arg2: memref<256x128xbf16, #tpu.memory_space<vmem>>, %arg3: memref<1x128xf32, #tpu.memory_space<vmem>>, %arg4: memref<1x128xf32, #tpu.memory_space<vmem>>, %arg5: memref<1x1024x128xbf16, #tpu.memory_space<vmem>>) attributes {dimension_semantics = [#tpu.dimension_semantics<parallel>], iteration_bounds = array<i64: 2>, scalar_prefetch = 0 : i64, scratch_operands = 0 : i64, tpu.core_type = #tpu.core_type<tc>, window_params = [{transform_indices = @transform_0, window_bounds = array<i64: 1, 1024, 256>}, {pipeline_mode = #tpu.pipeline_mode<synchronous>, transform_indices = @transform_1, window_bounds = array<i64: 256, 128>}, {pipeline_mode = #tpu.pipeline_mode<synchronous>, transform_indices = @transform_2, window_bounds = array<i64: 1, 128>}, {pipeline_mode = #tpu.pipeline_mode<synchronous>, transform_indices = @transform_3, window_bounds = array<i64: 1, 128>}, {transform_indices = @transform_4, window_bounds = array<i64: 1, 1024, 128>}]} {
    %c0 = arith.constant 0 : index
    %c0_0 = arith.constant 0 : index
    %c0_1 = arith.constant 0 : index
    %0 = vector.load %arg1[%c0, %c0_0, %c0_1] : memref<1x1024x256xbf16, #tpu.memory_space<vmem>>, vector<1x1024x256xbf16>
    %1 = vector.shape_cast %0 : vector<1x1024x256xbf16> to vector<1024x256xbf16>
    %c0_2 = arith.constant 0 : index
    %c0_3 = arith.constant 0 : index
    %2 = vector.load %arg2[%c0_2, %c0_3] : memref<256x128xbf16, #tpu.memory_space<vmem>>, vector<256x128xbf16>
    %cst = arith.constant dense<0.000000e+00> : vector<1024x128xf32>
    %3 = tpu.matmul %1, %2, %cst {dimension_numbers = #tpu.dot_dimension_numbers<[1], [0], [0], [1], [0, 0, 1, 1], [], []>} : vector<1024x256xbf16>, vector<256x128xbf16>, vector<1024x128xf32> -> vector<1024x128xf32>
    %4 = vector.shape_cast %3 : vector<1024x128xf32> to vector<1x1024x128xf32>
    %c0_4 = arith.constant 0 : index
    %c0_5 = arith.constant 0 : index
    %5 = vector.load %arg4[%c0_4, %c0_5] : memref<1x128xf32, #tpu.memory_space<vmem>>, vector<1x128xf32>
    %6 = vector.shape_cast %5 : vector<1x128xf32> to vector<1x1x128xf32>
    %7 = vector.broadcast %6 : vector<1x1x128xf32> to vector<1x1024x128xf32>
    %8 = arith.addf %4, %7 : vector<1x1024x128xf32>
    %9 = arith.truncf %8 : vector<1x1024x128xf32> to vector<1x1024x128xbf16>
    %c0_6 = arith.constant 0 : index
    %c0_7 = arith.constant 0 : index
    %c0_8 = arith.constant 0 : index
    %10 = vector.load %arg5[%c0_6, %c0_7, %c0_8] : memref<1x1024x128xbf16, #tpu.memory_space<vmem>>, vector<1x1024x128xbf16>
    tpu.vector_store %arg5[%c0_6, %c0_7, %c0_8], %9 {strides = array<i32>} : memref<1x1024x128xbf16, #tpu.memory_space<vmem>>, vector<1x1024x128xbf16>,
    return
  }
  func.func @transform_0(%arg0: i32) -> (i32, i32, i32) {
    %c0_i32 = arith.constant 0 : i32
    %c0_i32_0 = arith.constant 0 : i32
    %c0_i32_1 = arith.constant 0 : i32
    return %arg0, %c0_i32, %c0_i32_0 : i32, i32, i32
  }
  func.func @transform_1(%arg0: i32) -> (i32, i32) {
    %c0_i32 = arith.constant 0 : i32
    %c0_i32_0 = arith.constant 0 : i32
    %c0_i32_1 = arith.constant 0 : i32
    return %c0_i32, %c0_i32_0 : i32, i32
  }
  func.func @transform_2(%arg0: i32) -> (i32, i32) {
    %c0_i32 = arith.constant 0 : i32
    %c0_i32_0 = arith.constant 0 : i32
    %c0_i32_1 = arith.constant 0 : i32
    return %c0_i32, %c0_i32_0 : i32, i32
  }
  func.func @transform_3(%arg0: i32) -> (i32, i32) {
    %c0_i32 = arith.constant 0 : i32
    %c0_i32_0 = arith.constant 0 : i32
    %c0_i32_1 = arith.constant 0 : i32
    return %c0_i32, %c0_i32_0 : i32, i32
  }
  func.func @transform_4(%arg0: i32) -> (i32, i32, i32) {
    %c0_i32 = arith.constant 0 : i32
    %c0_i32_0 = arith.constant 0 : i32
    %c0_i32_1 = arith.constant 0 : i32
    return %arg0, %c0_i32, %c0_i32_0 : i32, i32, i32
  }
}

</mosaic_0001>

<bundles_post_ra>
// kernel: tpu_custom_call.1
= control target key start
LH: loop header
LB: loop body
LE: loop exit
PB: predicated region body
PF: predicated region fallthrough
CT: control target
= control target key end

     0   :  { %9 = vsyncpa [#allocation3], 0  ;;  %s4376_s0 = inlined_call_operand.hbm [shape: bf16[2,1024,256], index: 0, kind: input, shape index: {}]   ;;  %s4377_s1 = inlined_call_operand.hbm [shape: bf16[256,128], index: 1, kind: input, shape index: {}]   ;;  %s4378_s2 = inlined_call_operand.vmem [shape: f32[1,128], index: 2, kind: input, shape index: {}]   ;;  %s4379_s3 = inlined_call_operand.vmem [shape: f32[1,128], index: 3, kind: input, shape index: {}]   ;;  %s4380_s4 = inlined_call_operand.hbm [shape: bf16[2,1024,128], index: 4, kind: output, shape index: {}]  }
   0x1   :  { %11 = vsyncpa [#allocation3 + $0x1], 0 }
   0x2   :  { %12 = vsyncpa [#allocation6], 0 }
   0x3   :  { %13 = vsyncpa [#allocation4], 0 }
   0x4   :  { %15 = vsyncpa [#allocation4 + $0x1], 0  ;;  %s3817_s15 = smov 0   ;;  %s3819_s16 = smov 0  }
   0x5   :  { %s3821_s17 = smov 0   ;;  %s3823_s18 = smov 0  }
   0x6 LB: > { %s3838_s2 = sadd.s32 4294967295, %s3780_s18   ;;  %s2545_s19 = sadd.s32 4294967294, %s3780_s18   ;;  %s3780_s18 = sphi %s3823_s18, %s4400_s18   ;;  %s3776_s17 = sphi %s3821_s17, %s4399_s17   ;;  %s3772_s16 = sphi %s3819_s16, %s4398_s16   ;;  %s3768_s15 = sphi %s3817_s15, %s4397_s15  }
   0x7   : > { %p41_p0 = scmp.ne.s32.totalorder %s3772_s16, %s3768_s15  ;;  %p4381_p1 = scmp.eq.s32.totalorder %s3838_s2, 0 }
   0x8   : > { %p134_p3 = scmp.eq.s32.totalorder %s2545_s19, 1  ;;  %p2546_p5 = scmp.ge.s32.totalorder %s3780_s18, 1 }
   0x9   : > { %p3847_p4 = por %p4381_p1, %p41_p0  ;;  %p141_p7 = scmp.lt.s32.totalorder %s3780_s18, 3 }
   0xa   : > { %p3852_p6 = por %p134_p3, %p41_p0  ;;  %s3782_s23 = smov [#allocation5]  }
   0xb   : > { %s4384_s20 = scalar_select %p3847_p4, 1, 0 }
   0xc   : > { %s4385_s21 = scalar_select %p3852_p6, 1, 0 }
   0xd   : > { %p3857_p8 = pnand %p2546_p5, %p141_p7  ;;  %s153_s24 = sshll.u32 %s3782_s23, 4  ;;  %s3861_s24 = int_to_ptr.vmem [resolvable:$true] %s153_s24 }
   0xe   : > { %s3873_s26 = sadd.s32 1, %s3780_s18   ;;  %s28_s27 = sadd.s32 1, %s3776_s17 }
   0xf   : > { %s4386_s22 = scalar_select %p3857_p8, 1, 0 }
  0x10   : > { %p3387_p9 = pneg %p3857_p8  ;;  %s25_s28 = ssub.s32 %s3780_s18, %s3873_s26 }
  0x11   : > { %s3652_s5 = scalar_lea.hbm %s4377_s1, 2048 }
  0x12   : > { %p3868_p11 = pnand %p3387_p9, %p4381_p1  ;;  %p3653_p12 = scmp.ne.s32.totalorder %s4377_s1, %s3652_s5 }
  0x13   : > { %p3659_p5 = scmp.lt.u32.totalorder %s3652_s5, %s4377_s1 }
  0x14   : > { %p3654_p13 = pneg %p3868_p11 }
  0x16   : > { %p3655_p0 = pnand %p3654_p13, %p3653_p12 }
  0x18   : > { %p3656_p3 = pneg %p3655_p0 }
  0x1a   : > { %p3661_p7 = pnand %p3659_p5, %p3656_p3 }
  0x1c   : > { %3664 = shalt.err (!%p3661_p7)
}
  0x1d   : > { %s3665_s10 = scalar_lea.vmem %s3861_s24, 2048  ;;  %p3673_p2 = scmp.lt.s32.totalorder %s3861_s24, %s3861_s24 }
  0x1e   : > { %p3666_p9 = scmp.ne.s32.totalorder %s3861_s24, %s3665_s10  ;;  %p3674_p6 = scmp.lt.s32.totalorder %s3665_s10, %s3665_s10 }
  0x20   : > { %p3668_p10 = pnand %p3666_p9, %p3654_p13  ;;  %p3675_p4 = por %p3674_p6, %p3673_p2 }
  0x22   : > { %p3669_p1 = pneg %p3668_p10 }
  0x24   : > { %p3676_p8 = pnand %p3675_p4, %p3669_p1 }
  0x26   : > { %3679 = shalt.err (!%p3676_p8)
}
  0x27   : > { %s3783_s11 = smov 64   ;;  %s3784_s12 = smov 4  }
  0x28   : > { %3390 = dma.hbm_to_vmem [thread:$0]  (!%p3868_p11), %s4377_s1, 2048, %s3861_s24, [#allocation6], %s3783_s11, %s3783_s11, %s3784_s12  }
  0x29   : > { %p26_p2 = scmp.eq.s32.totalorder %s25_s28, 0  ;;  %p35_p1 = scmp.ne.s32.totalorder %s3776_s17, %s3772_s16 }
  0x2a   : > { %p36_p4 = scmp.eq.s32.totalorder %s3780_s18, 0  ;;  %p3400_p6 = scmp.lt.s32.totalorder %s3780_s18, 2 }
  0x2b   : > { %s3904_s19 = scalar_select %p26_p2, %s3776_s17, %s28_s27  }
  0x2c   : > { %p37_p8 = por %p36_p4, %p35_p1  ;;  %p4388_p10 = scmp.eq.s32.totalorder %s3838_s2, 1 }
  0x2d   : > { %s173_s29 = sand.u32 1, %s3776_s17   ;;  %s2834_s30 = sshll.u32 %s3780_s18, 14 }
  0x2e   : > { %p3908_p12 = por %p4388_p10, %p35_p1  ;;  %s2549_s5 = sshll.u32 %s173_s29, 10 }
  0x2f   : > { %s3917_s7 = scalar_lea.hbm %s4376_s0, %s2834_s30  ;;  %s177_s24 = scalar_lea.vmem [#allocation2], %s2549_s5 }
  0x30   : > { %s184_s27 = sshll.u32 %s177_s24, 4  ;;  %p3919_p11 = pnand %p3400_p6, %p37_p8  ;;  %s3923_s27 = int_to_ptr.vmem [resolvable:$true] %s184_s27 }
  0x31   : > { %s3925_s8 = scalar_lea.sflag [#allocation3], %s173_s29  ;;  %s3680_s9 = scalar_lea.hbm %s3917_s7, 16384 }
  0x32   : > { %p3681_p13 = scmp.ne.s32.totalorder %s3917_s7, %s3680_s9  ;;  %p3682_p0 = pneg %p3919_p11 }
  0x33   : > { %s3685_s12 = scalar_lea.hbm %s4376_s0, 32768  ;;  %p3686_p7 = scmp.lt.u32.totalorder %s3917_s7, %s4376_s0 }
  0x34   : > { %p3683_p3 = pnand %p3682_p0, %p3681_p13  ;;  %p3687_p9 = scmp.lt.u32.totalorder %s3685_s12, %s3680_s9 }
  0x35   : > { %p3689_p1 = scmp.lt.u32.totalorder %s3680_s9, %s3917_s7 }
  0x36   : > { %p3684_p5 = pneg %p3683_p3  ;;  %p3688_p2 = por %p3687_p9, %p3686_p7 }
  0x38   : > { %p3690_p4 = por %p3689_p1, %p3688_p2 }
  0x3a   : > { %p3691_p6 = pnand %p3690_p4, %p3684_p5 }
  0x3c   : > { %3694 = shalt.err (!%p3691_p6)
}
  0x3d   : > { %s3695_s29 = scalar_lea.vmem %s3923_s27, 16384  ;;  %s3785_s30 = smov [#allocation2]  }
  0x3e   : > { %p3696_p8 = scmp.ne.s32.totalorder %s3923_s27, %s3695_s29  ;;  %s3700_s5 = sshll.u32 %s3785_s30, 4  ;;  %s3701_s5 = int_to_ptr.vmem [resolvable:$false] %s3700_s5 }
  0x3f   : > { %s3702_s25 = scalar_lea.vmem %s3701_s5, 32768  ;;  %p3703_p3 = scmp.lt.s32.totalorder %s3923_s27, %s3701_s5 }
  0x40   : > { %p3698_p10 = pnand %p3696_p8, %p3682_p0  ;;  %p3704_p7 = scmp.lt.s32.totalorder %s3702_s25, %s3695_s29 }
  0x42   : > { %p3699_p13 = pneg %p3698_p10  ;;  %p3705_p9 = por %p3704_p7, %p3703_p3 }
  0x44   : > { %p3706_p2 = pnand %p3705_p9, %p3699_p13 }
  0x46   : > { %3709 = shalt.err (!%p3706_p2)
}
  0x47   : > { %s3786_s6 = smov 128   ;;  %s3787_s24 = smov 8  }
  0x48   : > { %3394 = dma.hbm_to_vmem [thread:$0]  (!%p3919_p11), %s3917_s7, 16384, %s3923_s27, %s3925_s8, %s3786_s6, %s3786_s6, %s3787_s24  }
  0x49   : > { %p4391_p0 = scmp.ne.s32.totalorder %s4386_s22, 0 }
  0x4a   : > { %s3956_s9 = sand.u32 (!%p4391_p0), 1, %s3772_s16   ;;  %p4392_p5 = scmp.ne.s32.totalorder (!%p4391_p0), %s4384_s20, 0 }
  0x4b   : > { %196 = sbr.rel (%p4391_p0) target bundleno = 632 (0x278), region = 36  ;;  %s2553_s10 = sshll.u32 (!%p4391_p0), %s3956_s9, 10 }
  0x4c   : > { %s199_s11 = scalar_lea.sflag (!%p4391_p0), [#allocation3], %s3956_s9  ;;  %s3960_s12 = scalar_lea.vmem (!%p4391_p0), [#allocation2], %s2553_s10 }
  0x52   : > { %3755 = dma.done.wait (%p4392_p5), %s199_s11, 16384  }
  0x53   : > { %3757 = vsyncadd (%p4392_p5), %s199_s11, 4294950912  ;;  %p4393_p11 = scmp.eq.s32.totalorder %s3838_s2, 0 }
  0x55   : > { %3759 = dma.done.wait (%p4393_p11), [#allocation6], 2048   ;;  %p4394_p1 = pmov %p4393_p11 }
  0x56   : > { %v3788_v0 = vmov 0   ;;  %v3443_v1 = vld [vmem:[#allocation5] sm:$0xff]   ;;  %v3444_v2 = vld [vmem:[#allocation5 + $0x8] sm:$0xff]   ;;  %v3445_v3 = vld [vmem:[#allocation5 + $0x10] sm:$0xff]   ;;  %s2555_s7 = sshll.u32 %s3956_s9, 9  ;;  %s2963_s13 = sshll.u32 %s3838_s2, 13 }
  0x57   : > { %3761 = vsyncadd (%p4394_p1), [#allocation6], 4294965248  ;;  %1128 = vmatprep.subr.bf16.mxu0 %v3788_v0  ;;  %3347 = vmatprep.subr.bf16.mxu1 %v3788_v0  ;;  %v3446_v4 = vld [vmem:[#allocation5 + $0x18] sm:$0xff]   ;;  %v3447_v5 = vld [vmem:[#allocation5 + $0x20] sm:$0xff]   ;;  %s4126_s27 = scalar_lea.vmem [#allocation7], %s2555_s7  ;;  %s4328_s5 = scalar_lea.hbm %s4380_s4, %s2963_s13 }
  0x58   : > { %1129 = vmatpush1.bf16.msra.mxu0 %v3443_v1  ;;  %3363 = vmatpush1.bf16.msra.mxu1 %v3443_v1  ;;  %v3461_v6 = vld [vmem:[%s3960_s12 + $0x4] ss:$8 sps:$4 sm:$0xff]   ;;  %v3449_v9 = vld [vmem:[#allocation5 + $0x30] sm:$0xff]   ;;  %v3450_v10 = vld [vmem:[#allocation5 + $0x38] sm:$0xff]   ;;  %s2462_s14 = sshll.u32 %s4126_s27, 4  ;;  %s2449_s2 = scalar_lea.sflag [#allocation4], %s3956_s9  ;;  %s4330_s14 = int_to_ptr.vmem [resolvable:$true] %s2462_s14 }
  0x59   : > { %1130 = vmatprep.subr.bf16.mxu0 %v3788_v0  ;;  %3348 = vmatprep.subr.bf16.mxu1 %v3788_v0  ;;  %v3448_v7 = vld [vmem:[#allocation5 + $0x28] sm:$0xff]   ;;  %v3451_v11 = vld [vmem:[#allocation5 + $0x40] sm:$0xff]   ;;  %v3453_v13 = vld [vmem:[#allocation5 + $0x50] sm:$0xff]   ;;  %s3710_s25 = scalar_lea.vmem %s4330_s14, 8192  ;;  %s3789_s6 = smov [#allocation7]  }
  0x5a   : > { %v3464_v8 = vld [vmem:[%s3960_s12 + $0x204] ss:$8 sps:$4 sm:$0xff]   ;;  %1160 = vmatprep.mubr.bf16.mxu0 %v3461_v6  ;;  %v3454_v14 = vld [vmem:[#allocation5 + $0x58] sm:$0xff]   ;;  %v3457_v17 = vld [vmem:[#allocation5 + $0x70] sm:$0xff]   ;;  %p3711_p4 = scmp.ne.s32.totalorder %s4330_s14, %s3710_s25  ;;  %s3714_s24 = sshll.u32 %s3789_s6, 4  ;;  %s3715_s24 = int_to_ptr.vmem [resolvable:$false] %s3714_s24 }
  0x5b   : > { %1416 = vmatprep.mubr.bf16.mxu1 %v3464_v8  ;;  %v3452_v12 = vld [vmem:[#allocation5 + $0x48] sm:$0xff]   ;;  %v3455_v15 = vld [vmem:[#allocation5 + $0x60] sm:$0xff]   ;;  %v3458_v18 = vld [vmem:[#allocation5 + $0x78] sm:$0xff]   ;;  %s3716_s10 = scalar_lea.vmem %s3715_s24, 16384  ;;  %p3717_p10 = scmp.lt.s32.totalorder %s4330_s14, %s3715_s24 }
  0x5c   : > { %1131 = vmatpush1.bf16.msra.mxu0 %v3444_v2  ;;  %3364 = vmatpush1.bf16.msra.mxu1 %v3444_v2  ;;  %v3456_v16 = vld [vmem:[#allocation5 + $0x68] sm:$0xff]   ;;  %v3465_v21 = vld [vmem:[%s3960_s12 + $0x14] ss:$8 sps:$4 sm:$0xff]   ;;  %v3469_v23 = vld [vmem:[%s3960_s12 + $0x10] ss:$8 sps:$4 sm:$0xff]   ;;  %p3712_p6 = pnand %p3711_p4, %p3908_p12  ;;  %p3718_p13 = scmp.lt.s32.totalorder %s3716_s10, %s3710_s25 }
  0x5d   : > { %1132 = vmatprep.subr.bf16.mxu0 %v3788_v0  ;;  %3349 = vmatprep.subr.bf16.mxu1 %v3788_v0  ;;  %v3459_v19 = vld [vmem:[%s3960_s12] ss:$8 sps:$4 sm:$0xff]   ;;  %v3467_v22 = vld [vmem:[%s3960_s12 + $0x214] ss:$8 sps:$4 sm:$0xff]   ;;  %v3470_v24 = vld [vmem:[%s3960_s12 + $0x210] ss:$8 sps:$4 sm:$0xff]  }
  0x5e   : > { %v3462_v20 = vld [vmem:[%s3960_s12 + $0x200] ss:$8 sps:$4 sm:$0xff]   ;;  %v3471_v25 = vld [vmem:[%s3960_s12 + $0x24] ss:$8 sps:$4 sm:$0xff]   ;;  %v3477_v29 = vld [vmem:[%s3960_s12 + $0x34] ss:$8 sps:$4 sm:$0xff]   ;;  %p3713_p8 = pneg %p3712_p6  ;;  %p3719_p3 = por %p3718_p13, %p3717_p10 }
  0x5f   : > { %v3473_v26 = vld [vmem:[%s3960_s12 + $0x224] ss:$8 sps:$4 sm:$0xff]   ;;  %v3475_v27 = vld [vmem:[%s3960_s12 + $0x20] ss:$8 sps:$4 sm:$0xff]   ;;  %v3479_v30 = vld [vmem:[%s3960_s12 + $0x234] ss:$8 sps:$4 sm:$0xff]  }
  0x60   : > { %1133 = vmatpush1.bf16.msra.mxu0 %v3445_v3  ;;  %3365 = vmatpush1.bf16.msra.mxu1 %v3445_v3  ;;  %v3476_v28 = vld [vmem:[%s3960_s12 + $0x220] ss:$8 sps:$4 sm:$0xff]   ;;  %v3481_v31 = vld [vmem:[%s3960_s12 + $0x30] ss:$8 sps:$4 sm:$0xff]   ;;  %v3483_v33 = vld [vmem:[%s3960_s12 + $0x44] ss:$8 sps:$4 sm:$0xff]   ;;  %p3720_p7 = pnand %p3719_p3, %p3713_p8 }
  0x61   : > { %1134 = vmatprep.subr.bf16.mxu0 %v3788_v0  ;;  %3350 = vmatprep.subr.bf16.mxu1 %v3788_v0  ;;  %v3482_v32 = vld [vmem:[%s3960_s12 + $0x230] ss:$8 sps:$4 sm:$0xff]   ;;  %v3485_v34 = vld [vmem:[%s3960_s12 + $0x244] ss:$8 sps:$4 sm:$0xff]   ;;  %v3487_v35 = vld [vmem:[%s3960_s12 + $0x40] ss:$8 sps:$4 sm:$0xff]  }
  0x62   : > { %v3488_v36 = vld [vmem:[%s3960_s12 + $0x240] ss:$8 sps:$4 sm:$0xff]   ;;  %v3489_v37 = vld [vmem:[%s3960_s12 + $0x54] ss:$8 sps:$4 sm:$0xff]   ;;  %v3493_v39 = vld [vmem:[%s3960_s12 + $0x50] ss:$8 sps:$4 sm:$0xff]  }
  0x63   : > { %v3491_v38 = vld [vmem:[%s3960_s12 + $0x254] ss:$8 sps:$4 sm:$0xff]   ;;  %v3494_v40 = vld [vmem:[%s3960_s12 + $0x250] ss:$8 sps:$4 sm:$0xff]   ;;  %v3495_v41 = vld [vmem:[%s3960_s12 + $0x64] ss:$8 sps:$4 sm:$0xff]  }
  0x64   : > { %1135 = vmatpush1.bf16.msra.mxu0 %v3446_v4  ;;  %3366 = vmatpush1.bf16.msra.mxu1 %v3446_v4  ;;  %v3497_v42 = vld [vmem:[%s3960_s12 + $0x264] ss:$8 sps:$4 sm:$0xff]   ;;  %v3499_v43 = vld [vmem:[%s3960_s12 + $0x60] ss:$8 sps:$4 sm:$0xff]   ;;  %v3501_v45 = vld [vmem:[%s3960_s12 + $0x74] ss:$8 sps:$4 sm:$0xff]  }
  0x65   : > { %1136 = vmatprep.subr.bf16.mxu0 %v3788_v0  ;;  %3351 = vmatprep.subr.bf16.mxu1 %v3788_v0  ;;  %v3500_v44 = vld [vmem:[%s3960_s12 + $0x260] ss:$8 sps:$4 sm:$0xff]   ;;  %v3503_v46 = vld [vmem:[%s3960_s12 + $0x274] ss:$8 sps:$4 sm:$0xff]   ;;  %v3505_v47 = vld [vmem:[%s3960_s12 + $0x70] ss:$8 sps:$4 sm:$0xff]  }
  0x66   : > { %v3506_v48 = vld [vmem:[%s3960_s12 + $0x270] ss:$8 sps:$4 sm:$0xff]   ;;  %v3507_v49 = vld [vmem:[%s3960_s12 + $0x84] ss:$8 sps:$4 sm:$0xff]   ;;  %v3511_v51 = vld [vmem:[%s3960_s12 + $0x80] ss:$8 sps:$4 sm:$0xff]  }
  0x67   : > { %v3509_v50 = vld [vmem:[%s3960_s12 + $0x284] ss:$8 sps:$4 sm:$0xff]   ;;  %v3512_v52 = vld [vmem:[%s3960_s12 + $0x280] ss:$8 sps:$4 sm:$0xff]   ;;  %v3513_v53 = vld [vmem:[%s3960_s12 + $0x94] ss:$8 sps:$4 sm:$0xff]  }
  0x68   : > { %1137 = vmatpush1.bf16.msra.mxu0 %v3447_v5  ;;  %3367 = vmatpush1.bf16.msra.mxu1 %v3447_v5  ;;  %v3515_v54 = vld [vmem:[%s3960_s12 + $0x294] ss:$8 sps:$4 sm:$0xff]   ;;  %v3517_v55 = vld [vmem:[%s3960_s12 + $0x90] ss:$8 sps:$4 sm:$0xff]   ;;  %v3519_v57 = vld [vmem:[%s3960_s12 + $0xa4] ss:$8 sps:$4 sm:$0xff]  }
  0x69   : > { %1138 = vmatprep.subr.bf16.mxu0 %v3788_v0  ;;  %3352 = vmatprep.subr.bf16.mxu1 %v3788_v0  ;;  %v3518_v56 = vld [vmem:[%s3960_s12 + $0x290] ss:$8 sps:$4 sm:$0xff]   ;;  %v3521_v58 = vld [vmem:[%s3960_s12 + $0x2a4] ss:$8 sps:$4 sm:$0xff]   ;;  %v3523_v59 = vld [vmem:[%s3960_s12 + $0xa0] ss:$8 sps:$4 sm:$0xff]  }
  0x6a   : > { %v3524_v60 = vld [vmem:[%s3960_s12 + $0x2a0] ss:$8 sps:$4 sm:$0xff]   ;;  %v3525_v61 = vld [vmem:[%s3960_s12 + $0xb4] ss:$8 sps:$4 sm:$0xff]   ;;  %v3529_v63 = vld [vmem:[%s3960_s12 + $0xb0] ss:$8 sps:$4 sm:$0xff]  }
  0x6b   : > { %v3527_v62 = vld [vmem:[%s3960_s12 + $0x2b4] ss:$8 sps:$4 sm:$0xff]   ;;  %v3531_v1 = vld [vmem:[%s3960_s12 + $0xc4] ss:$8 sps:$4 sm:$0xff]   ;;  %v3535_v3 = vld [vmem:[%s3960_s12 + $0xc0] ss:$8 sps:$4 sm:$0xff]  }
  0x6c   : > { %1139 = vmatpush1.bf16.msra.mxu0 %v3448_v7  ;;  %3368 = vmatpush1.bf16.msra.mxu1 %v3448_v7  ;;  %v3533_v2 = vld [vmem:[%s3960_s12 + $0x2c4] ss:$8 sps:$4 sm:$0xff]   ;;  %v3536_v4 = vld [vmem:[%s3960_s12 + $0x2c0] ss:$8 sps:$4 sm:$0xff]   ;;  %v3537_v5 = vld [vmem:[%s3960_s12 + $0xd4] ss:$8 sps:$4 sm:$0xff]  }
  0x6d   : > { %1140 = vmatprep.subr.bf16.mxu0 %v3788_v0  ;;  %3353 = vmatprep.subr.bf16.mxu1 %v3788_v0  ;;  %v3539_v6 = vld [vmem:[%s3960_s12 + $0x2d4] ss:$8 sps:$4 sm:$0xff]   ;;  %v3541_v7 = vld [vmem:[%s3960_s12 + $0xd0] ss:$8 sps:$4 sm:$0xff]  }
  0x6e   : > { %v3542_v8 = vld [vmem:[%s3960_s12 + $0x2d0] ss:$8 sps:$4 sm:$0xff]  }
  0x70   : > { %1141 = vmatpush1.bf16.msra.mxu0 %v3449_v9  ;;  %3369 = vmatpush1.bf16.msra.mxu1 %v3449_v9  ;;  %v3543_v9 = vld [vmem:[%s3960_s12 + $0xe4] ss:$8 sps:$4 sm:$0xff]  }
  0x71   : > { %1142 = vmatprep.subr.bf16.mxu0 %v3788_v0  ;;  %3354 = vmatprep.subr.bf16.mxu1 %v3788_v0 }
  0x74   : > { %1143 = vmatpush1.bf16.msra.mxu0 %v3450_v10  ;;  %3370 = vmatpush1.bf16.msra.mxu1 %v3450_v10  ;;  %v3545_v10 = vld [vmem:[%s3960_s12 + $0x2e4] ss:$8 sps:$4 sm:$0xff]  }
  0x75   : > { %1144 = vmatprep.subr.bf16.mxu0 %v3788_v0  ;;  %3355 = vmatprep.subr.bf16.mxu1 %v3788_v0 }
  0x78   : > { %1145 = vmatpush1.bf16.msra.mxu0 %v3451_v11  ;;  %3371 = vmatpush1.bf16.msra.mxu1 %v3451_v11  ;;  %v3547_v11 = vld [vmem:[%s3960_s12 + $0xe0] ss:$8 sps:$4 sm:$0xff]  }
  0x79   : > { %1146 = vmatprep.subr.bf16.mxu0 %v3788_v0  ;;  %3356 = vmatprep.subr.bf16.mxu1 %v3788_v0 }
  0x7c   : > { %1147 = vmatpush1.bf16.msra.mxu0 %v3452_v12  ;;  %3372 = vmatpush1.bf16.msra.mxu1 %v3452_v12  ;;  %v3548_v12 = vld [vmem:[%s3960_s12 + $0x2e0] ss:$8 sps:$4 sm:$0xff]  }
  0x7d   : > { %1148 = vmatprep.subr.bf16.mxu0 %v3788_v0  ;;  %3357 = vmatprep.subr.bf16.mxu1 %v3788_v0 }
  0x80   : > { %1149 = vmatpush1.bf16.msra.mxu0 %v3453_v13  ;;  %3373 = vmatpush1.bf16.msra.mxu1 %v3453_v13  ;;  %v3549_v13 = vld [vmem:[%s3960_s12 + $0xf4] ss:$8 sps:$4 sm:$0xff]  }
  0x81   : > { %1150 = vmatprep.subr.bf16.mxu0 %v3788_v0  ;;  %3358 = vmatprep.subr.bf16.mxu1 %v3788_v0 }
  0x84   : > { %1151 = vmatpush1.bf16.msra.mxu0 %v3454_v14  ;;  %3374 = vmatpush1.bf16.msra.mxu1 %v3454_v14  ;;  %v3551_v14 = vld [vmem:[%s3960_s12 + $0x2f4] ss:$8 sps:$4 sm:$0xff]  }
  0x85   : > { %1152 = vmatprep.subr.bf16.mxu0 %v3788_v0  ;;  %3359 = vmatprep.subr.bf16.mxu1 %v3788_v0 }
  0x88   : > { %1153 = vmatpush1.bf16.msra.mxu0 %v3455_v15  ;;  %3375 = vmatpush1.bf16.msra.mxu1 %v3455_v15  ;;  %v3553_v15 = vld [vmem:[%s3960_s12 + $0xf0] ss:$8 sps:$4 sm:$0xff]  }
  0x89   : > { %1154 = vmatprep.subr.bf16.mxu0 %v3788_v0  ;;  %3360 = vmatprep.subr.bf16.mxu1 %v3788_v0 }
  0x8c   : > { %1155 = vmatpush1.bf16.msra.mxu0 %v3456_v16  ;;  %3376 = vmatpush1.bf16.msra.mxu1 %v3456_v16  ;;  %v3554_v16 = vld [vmem:[%s3960_s12 + $0x2f0] ss:$8 sps:$4 sm:$0xff]  }
  0x8d   : > { %1156 = vmatprep.subr.bf16.mxu0 %v3788_v0  ;;  %3361 = vmatprep.subr.bf16.mxu1 %v3788_v0 }
  0x90   : > { %1157 = vmatpush1.bf16.msra.mxu0 %v3457_v17  ;;  %3377 = vmatpush1.bf16.msra.mxu1 %v3457_v17  ;;  %v3555_v17 = vld [vmem:[%s3960_s12 + $0x104] ss:$8 sps:$4 sm:$0xff]  }
  0x91   : > { %1158 = vmatprep.subr.bf16.mxu0 %v3788_v0  ;;  %3362 = vmatprep.subr.bf16.mxu1 %v3788_v0  ;;  %v3530_v0 = vld [vmem:[%s3960_s12 + $0x2b0] ss:$8 sps:$4 sm:$0xff]  }
  0x94   : > { %1159 = vmatpush1.bf16.msra.mxu0 %v3458_v18  ;;  %3378 = vmatpush1.bf16.msra.mxu1 %v3458_v18  ;;  %v3557_v18 = vld [vmem:[%s3960_s12 + $0x304] ss:$8 sps:$4 sm:$0xff]  }
  0x97   : > { %1161 = vmatmul.mubr.bf16.vlgmr.msra.gmra.mrb[0].mxu0 %v3459_v19  ;;  %1417 = vmatmul.mubr.bf16.vlgmr.msra.gmra.mrb[0].mxu1 %v3462_v20  ;;  %v3559_v19 = vld [vmem:[%s3960_s12 + $0x100] ss:$8 sps:$4 sm:$0xff]  }
  0x98   : > { %1168 = vmatprep.mubr.bf16.mxu0 %v3465_v21  ;;  %1424 = vmatprep.mubr.bf16.mxu1 %v3467_v22  ;;  %v3560_v20 = vld [vmem:[%s3960_s12 + $0x300] ss:$8 sps:$4 sm:$0xff]   ;;  %v3561_v21 = vld [vmem:[%s3960_s12 + $0x114] ss:$8 sps:$4 sm:$0xff]  }
  0x99   : > { %v3563_v22 = vld [vmem:[%s3960_s12 + $0x314] ss:$8 sps:$4 sm:$0xff]  }
  0x9f   : > { %1169 = vmatmul.mubr.bf16.gmra.mrb[4].mxu0 %v3469_v23  ;;  %1425 = vmatmul.mubr.bf16.gmra.mrb[4].mxu1 %v3470_v24  ;;  %v3565_v23 = vld [vmem:[%s3960_s12 + $0x110] ss:$8 sps:$4 sm:$0xff]  }
  0xa0   : > { %1176 = vmatprep.mubr.bf16.mxu0 %v3471_v25  ;;  %1432 = vmatprep.mubr.bf16.mxu1 %v3473_v26  ;;  %v3566_v24 = vld [vmem:[%s3960_s12 + $0x310] ss:$8 sps:$4 sm:$0xff]   ;;  %v3567_v25 = vld [vmem:[%s3960_s12 + $0x124] ss:$8 sps:$4 sm:$0xff]  }
  0xa1   : > { %v3569_v26 = vld [vmem:[%s3960_s12 + $0x324] ss:$8 sps:$4 sm:$0xff]  }
  0xa7   : > { %1177 = vmatmul.mubr.bf16.gmra.mrb[8].mxu0 %v3475_v27  ;;  %1433 = vmatmul.mubr.bf16.gmra.mrb[8].mxu1 %v3476_v28  ;;  %v3571_v27 = vld [vmem:[%s3960_s12 + $0x120] ss:$8 sps:$4 sm:$0xff]  }
  0xa8   : > { %1184 = vmatprep.mubr.bf16.mxu0 %v3477_v29  ;;  %1440 = vmatprep.mubr.bf16.mxu1 %v3479_v30  ;;  %v3572_v28 = vld [vmem:[%s3960_s12 + $0x320] ss:$8 sps:$4 sm:$0xff]   ;;  %v3573_v29 = vld [vmem:[%s3960_s12 + $0x134] ss:$8 sps:$4 sm:$0xff]  }
  0xa9   : > { %v3575_v30 = vld [vmem:[%s3960_s12 + $0x334] ss:$8 sps:$4 sm:$0xff]  }
  0xaf   : > { %1185 = vmatmul.mubr.bf16.gmra.mrb[12].mxu0 %v3481_v31  ;;  %1441 = vmatmul.mubr.bf16.gmra.mrb[12].mxu1 %v3482_v32  ;;  %v3577_v31 = vld [vmem:[%s3960_s12 + $0x130] ss:$8 sps:$4 sm:$0xff]  }
  0xb0   : > { %1192 = vmatprep.mubr.bf16.mxu0 %v3483_v33  ;;  %1448 = vmatprep.mubr.bf16.mxu1 %v3485_v34  ;;  %v3578_v32 = vld [vmem:[%s3960_s12 + $0x330] ss:$8 sps:$4 sm:$0xff]   ;;  %v3579_v33 = vld [vmem:[%s3960_s12 + $0x144] ss:$8 sps:$4 sm:$0xff]  }
  0xb1   : > { %v3581_v34 = vld [vmem:[%s3960_s12 + $0x344] ss:$8 sps:$4 sm:$0xff]  }
  0xb7   : > { %1193 = vmatmul.mubr.bf16.gmra.mrb[16].mxu0 %v3487_v35  ;;  %1449 = vmatmul.mubr.bf16.gmra.mrb[16].mxu1 %v3488_v36  ;;  %v3583_v35 = vld [vmem:[%s3960_s12 + $0x140] ss:$8 sps:$4 sm:$0xff]  }
  0xb8   : > { %1200 = vmatprep.mubr.bf16.mxu0 %v3489_v37  ;;  %1456 = vmatprep.mubr.bf16.mxu1 %v3491_v38  ;;  %v3584_v36 = vld [vmem:[%s3960_s12 + $0x340] ss:$8 sps:$4 sm:$0xff]   ;;  %v3585_v37 = vld [vmem:[%s3960_s12 + $0x154] ss:$8 sps:$4 sm:$0xff]  }
  0xb9   : > { %v3587_v38 = vld [vmem:[%s3960_s12 + $0x354] ss:$8 sps:$4 sm:$0xff]  }
  0xbf   : > { %1201 = vmatmul.mubr.bf16.gmra.mrb[20].mxu0 %v3493_v39  ;;  %1457 = vmatmul.mubr.bf16.gmra.mrb[20].mxu1 %v3494_v40  ;;  %v3589_v39 = vld [vmem:[%s3960_s12 + $0x150] ss:$8 sps:$4 sm:$0xff]  }
  0xc0   : > { %1208 = vmatprep.mubr.bf16.mxu0 %v3495_v41  ;;  %1464 = vmatprep.mubr.bf16.mxu1 %v3497_v42  ;;  %v3590_v40 = vld [vmem:[%s3960_s12 + $0x350] ss:$8 sps:$4 sm:$0xff]   ;;  %v3591_v41 = vld [vmem:[%s3960_s12 + $0x164] ss:$8 sps:$4 sm:$0xff]  }
  0xc1   : > { %v3593_v42 = vld [vmem:[%s3960_s12 + $0x364] ss:$8 sps:$4 sm:$0xff]  }
  0xc7   : > { %1209 = vmatmul.mubr.bf16.gmra.mrb[24].mxu0 %v3499_v43  ;;  %1465 = vmatmul.mubr.bf16.gmra.mrb[24].mxu1 %v3500_v44  ;;  %v3595_v43 = vld [vmem:[%s3960_s12 + $0x160] ss:$8 sps:$4 sm:$0xff]  }
  0xc8   : > { %1216 = vmatprep.mubr.bf16.mxu0 %v3501_v45  ;;  %1472 = vmatprep.mubr.bf16.mxu1 %v3503_v46  ;;  %v3596_v44 = vld [vmem:[%s3960_s12 + $0x360] ss:$8 sps:$4 sm:$0xff]   ;;  %v3597_v45 = vld [vmem:[%s3960_s12 + $0x174] ss:$8 sps:$4 sm:$0xff]  }
  0xc9   : > { %v3599_v46 = vld [vmem:[%s3960_s12 + $0x374] ss:$8 sps:$4 sm:$0xff]  }
  0xcf   : > { %1217 = vmatmul.mubr.bf16.gmra.mrb[28].mxu0 %v3505_v47  ;;  %1473 = vmatmul.mubr.bf16.gmra.mrb[28].mxu1 %v3506_v48  ;;  %v3601_v47 = vld [vmem:[%s3960_s12 + $0x170] ss:$8 sps:$4 sm:$0xff]  }
  0xd0   : > { %1224 = vmatprep.mubr.bf16.mxu0 %v3507_v49  ;;  %1480 = vmatprep.mubr.bf16.mxu1 %v3509_v50  ;;  %v3602_v48 = vld [vmem:[%s3960_s12 + $0x370] ss:$8 sps:$4 sm:$0xff]   ;;  %v3603_v49 = vld [vmem:[%s3960_s12 + $0x184] ss:$8 sps:$4 sm:$0xff]  }
  0xd1   : > { %v3605_v50 = vld [vmem:[%s3960_s12 + $0x384] ss:$8 sps:$4 sm:$0xff]  }
  0xd7   : > { %1225 = vmatmul.mubr.bf16.gmra.mrb[32].mxu0 %v3511_v51  ;;  %1481 = vmatmul.mubr.bf16.gmra.mrb[32].mxu1 %v3512_v52  ;;  %v3607_v51 = vld [vmem:[%s3960_s12 + $0x180] ss:$8 sps:$4 sm:$0xff]  }
  0xd8   : > { %1232 = vmatprep.mubr.bf16.mxu0 %v3513_v53  ;;  %1488 = vmatprep.mubr.bf16.mxu1 %v3515_v54  ;;  %v3608_v52 = vld [vmem:[%s3960_s12 + $0x380] ss:$8 sps:$4 sm:$0xff]   ;;  %v3609_v53 = vld [vmem:[%s3960_s12 + $0x194] ss:$8 sps:$4 sm:$0xff]  }
  0xd9   : > { %v3611_v54 = vld [vmem:[%s3960_s12 + $0x394] ss:$8 sps:$4 sm:$0xff]  }
  0xdf   : > { %1233 = vmatmul.mubr.bf16.gmra.mrb[36].mxu0 %v3517_v55  ;;  %1489 = vmatmul.mubr.bf16.gmra.mrb[36].mxu1 %v3518_v56  ;;  %v3613_v55 = vld [vmem:[%s3960_s12 + $0x190] ss:$8 sps:$4 sm:$0xff]  }
  0xe0   : > { %1240 = vmatprep.mubr.bf16.mxu0 %v3519_v57  ;;  %1496 = vmatprep.mubr.bf16.mxu1 %v3521_v58  ;;  %v3614_v56 = vld [vmem:[%s3960_s12 + $0x390] ss:$8 sps:$4 sm:$0xff]   ;;  %v3615_v57 = vld [vmem:[%s3960_s12 + $0x1a4] ss:$8 sps:$4 sm:$0xff]  }
  0xe1   : > { %v3617_v58 = vld [vmem:[%s3960_s12 + $0x3a4] ss:$8 sps:$4 sm:$0xff]  }
  0xe7   : > { %1241 = vmatmul.mubr.bf16.gmra.mrb[40].mxu0 %v3523_v59  ;;  %1497 = vmatmul.mubr.bf16.gmra.mrb[40].mxu1 %v3524_v60  ;;  %v3619_v59 = vld [vmem:[%s3960_s12 + $0x1a0] ss:$8 sps:$4 sm:$0xff]  }
  0xe8   : > { %1248 = vmatprep.mubr.bf16.mxu0 %v3525_v61  ;;  %1504 = vmatprep.mubr.bf16.mxu1 %v3527_v62  ;;  %v3620_v60 = vld [vmem:[%s3960_s12 + $0x3a0] ss:$8 sps:$4 sm:$0xff]   ;;  %v3621_v61 = vld [vmem:[%s3960_s12 + $0x1b4] ss:$8 sps:$4 sm:$0xff]  }
  0xe9   : > { %v3623_v62 = vld [vmem:[%s3960_s12 + $0x3b4] ss:$8 sps:$4 sm:$0xff]  }
  0xef   : > { %1249 = vmatmul.mubr.bf16.gmra.mrb[44].mxu0 %v3529_v63  ;;  %1505 = vmatmul.mubr.bf16.gmra.mrb[44].mxu1 %v3530_v0  ;;  %v4115_v0 = vld [vmem:[%s4379_s3] ss:$0 sm:$0xff] }
  0xf0   : > { %1256 = vmatprep.mubr.bf16.mxu0 %v3531_v1  ;;  %1512 = vmatprep.mubr.bf16.mxu1 %v3533_v2 }
  0xf7   : > { %1257 = vmatmul.mubr.bf16.gmra.mrb[48].mxu0 %v3535_v3  ;;  %1513 = vmatmul.mubr.bf16.gmra.mrb[48].mxu1 %v3536_v4  ;;  %v3625_v4 = vld [vmem:[%s3960_s12 + $0x1b0] ss:$8 sps:$4 sm:$0xff]  }
  0xf8   : > { %1264 = vmatprep.mubr.bf16.mxu0 %v3537_v5  ;;  %1520 = vmatprep.mubr.bf16.mxu1 %v3539_v6  ;;  %v3626_v5 = vld [vmem:[%s3960_s12 + $0x3b0] ss:$8 sps:$4 sm:$0xff]  }
  0xff   : > { %1265 = vmatmul.mubr.bf16.gmra.mrb[52].mxu0 %v3541_v7  ;;  %1521 = vmatmul.mubr.bf16.gmra.mrb[52].mxu1 %v3542_v8  ;;  %v3627_v8 = vld [vmem:[%s3960_s12 + $0x1c4] ss:$8 sps:$4 sm:$0xff]  }
 0x100   : > { %1272 = vmatprep.mubr.bf16.mxu0 %v3543_v9  ;;  %1528 = vmatprep.mubr.bf16.mxu1 %v3545_v10  ;;  %v3629_v9 = vld [vmem:[%s3960_s12 + $0x3c4] ss:$8 sps:$4 sm:$0xff]  }
 0x107   : > { %1273 = vmatmul.mubr.bf16.gmra.mrb[56].mxu0 %v3547_v11  ;;  %1529 = vmatmul.mubr.bf16.gmra.mrb[56].mxu1 %v3548_v12 }
 0x108   : > { %1280 = vmatprep.mubr.bf16.mxu0 %v3549_v13  ;;  %1536 = vmatprep.mubr.bf16.mxu1 %v3551_v14 }
 0x10f   : > { %1281 = vmatmul.mubr.bf16.gmra.mrb[60].mxu0 %v3553_v15  ;;  %1537 = vmatmul.mubr.bf16.gmra.mrb[60].mxu1 %v3554_v16 }
 0x110   : > { %1288 = vmatprep.mubr.bf16.mxu0 %v3555_v17  ;;  %1544 = vmatprep.mubr.bf16.mxu1 %v3557_v18 }
 0x117   : > { %1289 = vmatmul.mubr.bf16.gmra.mrb[64].mxu0 %v3559_v19  ;;  %1545 = vmatmul.mubr.bf16.gmra.mrb[64].mxu1 %v3560_v20 }
 0x118   : > { %1296 = vmatprep.mubr.bf16.mxu0 %v3561_v21  ;;  %1552 = vmatprep.mubr.bf16.mxu1 %v3563_v22  ;;  %v3631_v22 = vld [vmem:[%s3960_s12 + $0x1c0] ss:$8 sps:$4 sm:$0xff]  }
 0x11f   : > { %1297 = vmatmul.mubr.bf16.gmra.mrb[68].mxu0 %v3565_v23  ;;  %1553 = vmatmul.mubr.bf16.gmra.mrb[68].mxu1 %v3566_v24  ;;  %v3632_v23 = vld [vmem:[%s3960_s12 + $0x3c0] ss:$8 sps:$4 sm:$0xff]  }
 0x120   : > { %1304 = vmatprep.mubr.bf16.mxu0 %v3567_v25  ;;  %1560 = vmatprep.mubr.bf16.mxu1 %v3569_v26  ;;  %v3633_v26 = vld [vmem:[%s3960_s12 + $0x1d4] ss:$8 sps:$4 sm:$0xff]  }
 0x127   : > { %1305 = vmatmul.mubr.bf16.gmra.mrb[72].mxu0 %v3571_v27  ;;  %1561 = vmatmul.mubr.bf16.gmra.mrb[72].mxu1 %v3572_v28  ;;  %v3635_v27 = vld [vmem:[%s3960_s12 + $0x3d4] ss:$8 sps:$4 sm:$0xff]  }
 0x128   : > { %1312 = vmatprep.mubr.bf16.mxu0 %v3573_v29  ;;  %1568 = vmatprep.mubr.bf16.mxu1 %v3575_v30 }
 0x12f   : > { %1313 = vmatmul.mubr.bf16.gmra.mrb[76].mxu0 %v3577_v31  ;;  %1569 = vmatmul.mubr.bf16.gmra.mrb[76].mxu1 %v3578_v32 }
 0x130   : > { %1320 = vmatprep.mubr.bf16.mxu0 %v3579_v33  ;;  %1576 = vmatprep.mubr.bf16.mxu1 %v3581_v34 }
 0x137   : > { %1321 = vmatmul.mubr.bf16.gmra.mrb[80].mxu0 %v3583_v35  ;;  %1577 = vmatmul.mubr.bf16.gmra.mrb[80].mxu1 %v3584_v36 }
 0x138   : > { %1328 = vmatprep.mubr.bf16.mxu0 %v3585_v37  ;;  %1584 = vmatprep.mubr.bf16.mxu1 %v3587_v38 }
 0x13f   : > { %1329 = vmatmul.mubr.bf16.gmra.mrb[84].mxu0 %v3589_v39  ;;  %1585 = vmatmul.mubr.bf16.gmra.mrb[84].mxu1 %v3590_v40  ;;  %v3637_v40 = vld [vmem:[%s3960_s12 + $0x1d0] ss:$8 sps:$4 sm:$0xff]  }
 0x140   : > { %1336 = vmatprep.mubr.bf16.mxu0 %v3591_v41  ;;  %1592 = vmatprep.mubr.bf16.mxu1 %v3593_v42  ;;  %v3638_v41 = vld [vmem:[%s3960_s12 + $0x3d0] ss:$8 sps:$4 sm:$0xff]  }
 0x147   : > { %1337 = vmatmul.mubr.bf16.gmra.mrb[88].mxu0 %v3595_v43  ;;  %1593 = vmatmul.mubr.bf16.gmra.mrb[88].mxu1 %v3596_v44  ;;  %v3639_v44 = vld [vmem:[%s3960_s12 + $0x1e4] ss:$8 sps:$4 sm:$0xff]  }
 0x148   : > { %1344 = vmatprep.mubr.bf16.mxu0 %v3597_v45  ;;  %1600 = vmatprep.mubr.bf16.mxu1 %v3599_v46  ;;  %v3641_v45 = vld [vmem:[%s3960_s12 + $0x3e4] ss:$8 sps:$4 sm:$0xff]  }
 0x14f   : > { %1345 = vmatmul.mubr.bf16.gmra.mrb[92].mxu0 %v3601_v47  ;;  %1601 = vmatmul.mubr.bf16.gmra.mrb[92].mxu1 %v3602_v48 }
 0x150   : > { %1352 = vmatprep.mubr.bf16.mxu0 %v3603_v49  ;;  %1608 = vmatprep.mubr.bf16.mxu1 %v3605_v50 }
 0x157   : > { %1353 = vmatmul.mubr.bf16.gmra.mrb[96].mxu0 %v3607_v51  ;;  %1609 = vmatmul.mubr.bf16.gmra.mrb[96].mxu1 %v3608_v52 }
 0x158   : > { %1360 = vmatprep.mubr.bf16.mxu0 %v3609_v53  ;;  %1616 = vmatprep.mubr.bf16.mxu1 %v3611_v54 }
 0x15f   : > { %1361 = vmatmul.mubr.bf16.gmra.mrb[100].mxu0 %v3613_v55  ;;  %1617 = vmatmul.mubr.bf16.gmra.mrb[100].mxu1 %v3614_v56 }
 0x160   : > { %1368 = vmatprep.mubr.bf16.mxu0 %v3615_v57  ;;  %1624 = vmatprep.mubr.bf16.mxu1 %v3617_v58  ;;  %v3643_v58 = vld [vmem:[%s3960_s12 + $0x1e0] ss:$8 sps:$4 sm:$0xff]  }
 0x167   : > { %1369 = vmatmul.mubr.bf16.gmra.mrb[104].mxu0 %v3619_v59  ;;  %1625 = vmatmul.mubr.bf16.gmra.mrb[104].mxu1 %v3620_v60  ;;  %v3644_v59 = vld [vmem:[%s3960_s12 + $0x3e0] ss:$8 sps:$4 sm:$0xff]  }
 0x168   : > { %1376 = vmatprep.mubr.bf16.mxu0 %v3621_v61  ;;  %1632 = vmatprep.mubr.bf16.mxu1 %v3623_v62  ;;  %v3645_v62 = vld [vmem:[%s3960_s12 + $0x1f4] ss:$8 sps:$4 sm:$0xff]  }
 0x16a   : > { %v1162_v63 = vpop.f32.mrb[0].mxu0  ;;  %v1418_v1 = vpop.f32.mrb[0].mxu1 }
 0x16b   : > { %v1164_v2 = vpop.f32.mrb[1].mxu0  ;;  %v1420_v3 = vpop.f32.mrb[1].mxu1  ;;  %v1680_v10 = vadd.f32 %v4115_v0, %v1162_v63  ;;  %v1744_v11 = vadd.f32 %v4115_v0, %v1418_v1  ;;  %v3647_v63 = vld [vmem:[%s3960_s12 + $0x3f4] ss:$8 sps:$4 sm:$0xff]  }
 0x16c   : > { %v1165_v6 = vpop.f32.mrb[2].mxu0  ;;  %v1421_v7 = vpop.f32.mrb[2].mxu1 }
 0x16d   : > { %v1681_v12 = vadd.f32 %v4115_v0, %v1165_v6  ;;  %v1745_v13 = vadd.f32 %v4115_v0, %v1421_v7  ;;  %v1167_v14 = vpop.f32.mrb[3].mxu0  ;;  %v1423_v15 = vpop.f32.mrb[3].mxu1 }
 0x16e   : > { %v3650_v14 = vld [vmem:[%s3960_s12 + $0x3f0] ss:$8 sps:$4 sm:$0xff]  }
 0x16f   : > { %v2967_v16 = vpack.c.bf16 %v1681_v12, %v1680_v10  ;;  %v3127_v17 = vpack.c.bf16 %v1745_v13, %v1744_v11  ;;  %1377 = vmatmul.mubr.bf16.gmra.mrb[108].mxu0 %v3625_v4  ;;  %1633 = vmatmul.mubr.bf16.gmra.mrb[108].mxu1 %v3626_v5  ;;  %v3649_v13 = vld [vmem:[%s3960_s12 + $0x1f0] ss:$8 sps:$4 sm:$0xff]  }
 0x170   : > { %1384 = vmatprep.mubr.bf16.mxu0 %v3627_v8  ;;  %1640 = vmatprep.mubr.bf16.mxu1 %v3629_v9 }
 0x171   : > { %2968 = vst [vmem:[%s4126_s27] sm:$0xff] %v2967_v16   ;;  %3315 = vst [vmem:[%s4126_s27 + $0x100] sm:$0xff] %v3127_v17  }
 0x172   : > { %v1170_v18 = vpop.f32.mrb[4].mxu0  ;;  %v1426_v19 = vpop.f32.mrb[4].mxu1 }
 0x173   : > { %v1172_v20 = vpop.f32.mrb[5].mxu0  ;;  %v1428_v21 = vpop.f32.mrb[5].mxu1  ;;  %v1682_v28 = vadd.f32 %v4115_v0, %v1170_v18  ;;  %v1746_v29 = vadd.f32 %v4115_v0, %v1426_v19 }
 0x174   : > { %v1173_v24 = vpop.f32.mrb[6].mxu0  ;;  %v1429_v25 = vpop.f32.mrb[6].mxu1 }
 0x175   : > { %v1683_v30 = vadd.f32 %v4115_v0, %v1173_v24  ;;  %v1747_v31 = vadd.f32 %v4115_v0, %v1429_v25  ;;  %v1175_v32 = vpop.f32.mrb[7].mxu0  ;;  %v1431_v33 = vpop.f32.mrb[7].mxu1 }
 0x177   : > { %v2972_v34 = vpack.c.bf16 %v1683_v30, %v1682_v28  ;;  %v3132_v35 = vpack.c.bf16 %v1747_v31, %v1746_v29  ;;  %1385 = vmatmul.mubr.bf16.gmra.mrb[112].mxu0 %v3631_v22  ;;  %1641 = vmatmul.mubr.bf16.gmra.mrb[112].mxu1 %v3632_v23 }
 0x178   : > { %1392 = vmatprep.mubr.bf16.mxu0 %v3633_v26  ;;  %1648 = vmatprep.mubr.bf16.mxu1 %v3635_v27 }
 0x179   : > { %3284 = vst [vmem:[%s4126_s27 + $0x8] sm:$0xff] %v2972_v34   ;;  %3316 = vst [vmem:[%s4126_s27 + $0x108] sm:$0xff] %v3132_v35  }
 0x17a   : > { %v1178_v36 = vpop.f32.mrb[8].mxu0  ;;  %v1434_v37 = vpop.f32.mrb[8].mxu1 }
 0x17b   : > { %v1180_v38 = vpop.f32.mrb[9].mxu0  ;;  %v1436_v39 = vpop.f32.mrb[9].mxu1  ;;  %v1684_v46 = vadd.f32 %v4115_v0, %v1178_v36  ;;  %v1748_v47 = vadd.f32 %v4115_v0, %v1434_v37 }
 0x17c   : > { %v1181_v42 = vpop.f32.mrb[10].mxu0  ;;  %v1437_v43 = vpop.f32.mrb[10].mxu1 }
 0x17d   : > { %v1685_v48 = vadd.f32 %v4115_v0, %v1181_v42  ;;  %v1749_v49 = vadd.f32 %v4115_v0, %v1437_v43  ;;  %v1183_v50 = vpop.f32.mrb[11].mxu0  ;;  %v1439_v51 = vpop.f32.mrb[11].mxu1 }
 0x17f   : > { %v2977_v52 = vpack.c.bf16 %v1685_v48, %v1684_v46  ;;  %v3137_v53 = vpack.c.bf16 %v1749_v49, %v1748_v47  ;;  %1393 = vmatmul.mubr.bf16.gmra.mrb[116].mxu0 %v3637_v40  ;;  %1649 = vmatmul.mubr.bf16.gmra.mrb[116].mxu1 %v3638_v41 }
 0x180   : > { %1400 = vmatprep.mubr.bf16.mxu0 %v3639_v44  ;;  %1656 = vmatprep.mubr.bf16.mxu1 %v3641_v45 }
 0x181   : > { %3285 = vst [vmem:[%s4126_s27 + $0x10] sm:$0xff] %v2977_v52   ;;  %3317 = vst [vmem:[%s4126_s27 + $0x110] sm:$0xff] %v3137_v53  }
 0x182   : > { %v1186_v54 = vpop.f32.mrb[12].mxu0  ;;  %v1442_v55 = vpop.f32.mrb[12].mxu1 }
 0x183   : > { %v1188_v56 = vpop.f32.mrb[13].mxu0  ;;  %v1444_v57 = vpop.f32.mrb[13].mxu1  ;;  %v1686_v1 = vadd.f32 %v4115_v0, %v1186_v54  ;;  %v1750_v2 = vadd.f32 %v4115_v0, %v1442_v55 }
 0x184   : > { %v1189_v60 = vpop.f32.mrb[14].mxu0  ;;  %v1445_v61 = vpop.f32.mrb[14].mxu1 }
 0x185   : > { %v1687_v3 = vadd.f32 %v4115_v0, %v1189_v60  ;;  %v1751_v4 = vadd.f32 %v4115_v0, %v1445_v61  ;;  %v1191_v5 = vpop.f32.mrb[15].mxu0  ;;  %v1447_v6 = vpop.f32.mrb[15].mxu1 }
 0x187   : > { %v2982_v7 = vpack.c.bf16 %v1687_v3, %v1686_v1  ;;  %v3142_v8 = vpack.c.bf16 %v1751_v4, %v1750_v2  ;;  %1401 = vmatmul.mubr.bf16.gmra.mrb[120].mxu0 %v3643_v58  ;;  %1657 = vmatmul.mubr.bf16.gmra.mrb[120].mxu1 %v3644_v59 }
 0x188   : > { %1408 = vmatprep.mubr.bf16.mxu0 %v3645_v62  ;;  %1664 = vmatprep.mubr.bf16.mxu1 %v3647_v63 }
 0x189   : > { %3286 = vst [vmem:[%s4126_s27 + $0x18] sm:$0xff] %v2982_v7   ;;  %3318 = vst [vmem:[%s4126_s27 + $0x118] sm:$0xff] %v3142_v8  }
 0x18a   : > { %v1194_v9 = vpop.f32.mrb[16].mxu0  ;;  %v1450_v10 = vpop.f32.mrb[16].mxu1 }
 0x18b   : > { %v1196_v11 = vpop.f32.mrb[17].mxu0  ;;  %v1452_v12 = vpop.f32.mrb[17].mxu1  ;;  %v1688_v17 = vadd.f32 %v4115_v0, %v1194_v9  ;;  %v1752_v18 = vadd.f32 %v4115_v0, %v1450_v10 }
 0x18c   : > { %v1197_v15 = vpop.f32.mrb[18].mxu0  ;;  %v1453_v16 = vpop.f32.mrb[18].mxu1 }
 0x18d   : > { %v1689_v19 = vadd.f32 %v4115_v0, %v1197_v15  ;;  %v1753_v20 = vadd.f32 %v4115_v0, %v1453_v16  ;;  %v1199_v21 = vpop.f32.mrb[19].mxu0  ;;  %v1455_v22 = vpop.f32.mrb[19].mxu1 }
 0x18f   : > { %v2987_v23 = vpack.c.bf16 %v1689_v19, %v1688_v17  ;;  %v3147_v24 = vpack.c.bf16 %v1753_v20, %v1752_v18  ;;  %1409 = vmatmul.mubr.bf16.gmra.mrb[124].mxu0 %v3649_v13  ;;  %1665 = vmatmul.mubr.bf16.gmra.mrb[124].mxu1 %v3650_v14 }
 0x191   : > { %3287 = vst [vmem:[%s4126_s27 + $0x20] sm:$0xff] %v2987_v23   ;;  %3319 = vst [vmem:[%s4126_s27 + $0x120] sm:$0xff] %v3147_v24  }
 0x192   : > { %v1202_v25 = vpop.f32.mrb[20].mxu0  ;;  %v1458_v26 = vpop.f32.mrb[20].mxu1 }
 0x193   : > { %v1204_v27 = vpop.f32.mrb[21].mxu0  ;;  %v1460_v28 = vpop.f32.mrb[21].mxu1  ;;  %v1690_v31 = vadd.f32 %v4115_v0, %v1202_v25  ;;  %v1754_v32 = vadd.f32 %v4115_v0, %v1458_v26 }
 0x194   : > { %v1205_v29 = vpop.f32.mrb[22].mxu0  ;;  %v1461_v30 = vpop.f32.mrb[22].mxu1 }
 0x195   : > { %v1691_v33 = vadd.f32 %v4115_v0, %v1205_v29  ;;  %v1755_v34 = vadd.f32 %v4115_v0, %v1461_v30  ;;  %v1207_v35 = vpop.f32.mrb[23].mxu0  ;;  %v1463_v36 = vpop.f32.mrb[23].mxu1 }
 0x197   : > { %v2992_v37 = vpack.c.bf16 %v1691_v33, %v1690_v31  ;;  %v3152_v38 = vpack.c.bf16 %v1755_v34, %v1754_v32 }
 0x199   : > { %3288 = vst [vmem:[%s4126_s27 + $0x28] sm:$0xff] %v2992_v37   ;;  %3320 = vst [vmem:[%s4126_s27 + $0x128] sm:$0xff] %v3152_v38  }
 0x19a   : > { %v1210_v39 = vpop.f32.mrb[24].mxu0  ;;  %v1466_v40 = vpop.f32.mrb[24].mxu1 }
 0x19b   : > { %v1212_v41 = vpop.f32.mrb[25].mxu0  ;;  %v1468_v42 = vpop.f32.mrb[25].mxu1  ;;  %v1692_v45 = vadd.f32 %v4115_v0, %v1210_v39  ;;  %v1756_v46 = vadd.f32 %v4115_v0, %v1466_v40 }
 0x19c   : > { %v1213_v43 = vpop.f32.mrb[26].mxu0  ;;  %v1469_v44 = vpop.f32.mrb[26].mxu1 }
 0x19d   : > { %v1693_v47 = vadd.f32 %v4115_v0, %v1213_v43  ;;  %v1757_v48 = vadd.f32 %v4115_v0, %v1469_v44  ;;  %v1215_v49 = vpop.f32.mrb[27].mxu0  ;;  %v1471_v50 = vpop.f32.mrb[27].mxu1 }
 0x19f   : > { %v2997_v51 = vpack.c.bf16 %v1693_v47, %v1692_v45  ;;  %v3157_v52 = vpack.c.bf16 %v1757_v48, %v1756_v46 }
 0x1a1   : > { %3289 = vst [vmem:[%s4126_s27 + $0x30] sm:$0xff] %v2997_v51   ;;  %3321 = vst [vmem:[%s4126_s27 + $0x130] sm:$0xff] %v3157_v52  }
 0x1a2   : > { %v1218_v53 = vpop.f32.mrb[28].mxu0  ;;  %v1474_v54 = vpop.f32.mrb[28].mxu1 }
 0x1a3   : > { %v1220_v55 = vpop.f32.mrb[29].mxu0  ;;  %v1476_v56 = vpop.f32.mrb[29].mxu1  ;;  %v1694_v59 = vadd.f32 %v4115_v0, %v1218_v53  ;;  %v1758_v60 = vadd.f32 %v4115_v0, %v1474_v54 }
 0x1a4   : > { %v1221_v57 = vpop.f32.mrb[30].mxu0  ;;  %v1477_v58 = vpop.f32.mrb[30].mxu1 }
 0x1a5   : > { %v1695_v61 = vadd.f32 %v4115_v0, %v1221_v57  ;;  %v1759_v62 = vadd.f32 %v4115_v0, %v1477_v58  ;;  %v1223_v63 = vpop.f32.mrb[31].mxu0  ;;  %v1479_v1 = vpop.f32.mrb[31].mxu1 }
 0x1a7   : > { %v3002_v2 = vpack.c.bf16 %v1695_v61, %v1694_v59  ;;  %v3162_v3 = vpack.c.bf16 %v1759_v62, %v1758_v60 }
 0x1a9   : > { %3290 = vst [vmem:[%s4126_s27 + $0x38] sm:$0xff] %v3002_v2   ;;  %3322 = vst [vmem:[%s4126_s27 + $0x138] sm:$0xff] %v3162_v3  }
 0x1aa   : > { %v1226_v4 = vpop.f32.mrb[32].mxu0  ;;  %v1482_v5 = vpop.f32.mrb[32].mxu1 }
 0x1ab   : > { %v1228_v6 = vpop.f32.mrb[33].mxu0  ;;  %v1484_v7 = vpop.f32.mrb[33].mxu1  ;;  %v1696_v10 = vadd.f32 %v4115_v0, %v1226_v4  ;;  %v1760_v11 = vadd.f32 %v4115_v0, %v1482_v5 }
 0x1ac   : > { %v1229_v8 = vpop.f32.mrb[34].mxu0  ;;  %v1485_v9 = vpop.f32.mrb[34].mxu1 }
 0x1ad   : > { %v1697_v12 = vadd.f32 %v4115_v0, %v1229_v8  ;;  %v1761_v13 = vadd.f32 %v4115_v0, %v1485_v9  ;;  %v1231_v14 = vpop.f32.mrb[35].mxu0  ;;  %v1487_v15 = vpop.f32.mrb[35].mxu1 }
 0x1af   : > { %v3007_v16 = vpack.c.bf16 %v1697_v12, %v1696_v10  ;;  %v3167_v17 = vpack.c.bf16 %v1761_v13, %v1760_v11 }
 0x1b1   : > { %3291 = vst [vmem:[%s4126_s27 + $0x40] sm:$0xff] %v3007_v16   ;;  %3323 = vst [vmem:[%s4126_s27 + $0x140] sm:$0xff] %v3167_v17  }
 0x1b2   : > { %v1234_v18 = vpop.f32.mrb[36].mxu0  ;;  %v1490_v19 = vpop.f32.mrb[36].mxu1 }
 0x1b3   : > { %v1236_v20 = vpop.f32.mrb[37].mxu0  ;;  %v1492_v21 = vpop.f32.mrb[37].mxu1  ;;  %v1698_v24 = vadd.f32 %v4115_v0, %v1234_v18  ;;  %v1762_v25 = vadd.f32 %v4115_v0, %v1490_v19 }
 0x1b4   : > { %v1237_v22 = vpop.f32.mrb[38].mxu0  ;;  %v1493_v23 = vpop.f32.mrb[38].mxu1 }
 0x1b5   : > { %v1699_v26 = vadd.f32 %v4115_v0, %v1237_v22  ;;  %v1763_v27 = vadd.f32 %v4115_v0, %v1493_v23  ;;  %v1239_v28 = vpop.f32.mrb[39].mxu0  ;;  %v1495_v29 = vpop.f32.mrb[39].mxu1 }
 0x1b7   : > { %v3012_v30 = vpack.c.bf16 %v1699_v26, %v1698_v24  ;;  %v3172_v31 = vpack.c.bf16 %v1763_v27, %v1762_v25 }
 0x1b9   : > { %3292 = vst [vmem:[%s4126_s27 + $0x48] sm:$0xff] %v3012_v30   ;;  %3324 = vst [vmem:[%s4126_s27 + $0x148] sm:$0xff] %v3172_v31  }
 0x1ba   : > { %v1242_v32 = vpop.f32.mrb[40].mxu0  ;;  %v1498_v33 = vpop.f32.mrb[40].mxu1 }
 0x1bb   : > { %v1244_v34 = vpop.f32.mrb[41].mxu0  ;;  %v1500_v35 = vpop.f32.mrb[41].mxu1  ;;  %v1700_v38 = vadd.f32 %v4115_v0, %v1242_v32  ;;  %v1764_v39 = vadd.f32 %v4115_v0, %v1498_v33 }
 0x1bc   : > { %v1245_v36 = vpop.f32.mrb[42].mxu0  ;;  %v1501_v37 = vpop.f32.mrb[42].mxu1 }
 0x1bd   : > { %v1701_v40 = vadd.f32 %v4115_v0, %v1245_v36  ;;  %v1765_v41 = vadd.f32 %v4115_v0, %v1501_v37  ;;  %v1247_v42 = vpop.f32.mrb[43].mxu0  ;;  %v1503_v43 = vpop.f32.mrb[43].mxu1 }
 0x1bf   : > { %v3017_v44 = vpack.c.bf16 %v1701_v40, %v1700_v38  ;;  %v3177_v45 = vpack.c.bf16 %v1765_v41, %v1764_v39 }
 0x1c1   : > { %3293 = vst [vmem:[%s4126_s27 + $0x50] sm:$0xff] %v3017_v44   ;;  %3325 = vst [vmem:[%s4126_s27 + $0x150] sm:$0xff] %v3177_v45  }
 0x1c2   : > { %v1250_v46 = vpop.f32.mrb[44].mxu0  ;;  %v1506_v47 = vpop.f32.mrb[44].mxu1 }
 0x1c3   : > { %v1252_v48 = vpop.f32.mrb[45].mxu0  ;;  %v1508_v49 = vpop.f32.mrb[45].mxu1  ;;  %v1702_v52 = vadd.f32 %v4115_v0, %v1250_v46  ;;  %v1766_v53 = vadd.f32 %v4115_v0, %v1506_v47 }
 0x1c4   : > { %v1253_v50 = vpop.f32.mrb[46].mxu0  ;;  %v1509_v51 = vpop.f32.mrb[46].mxu1 }
 0x1c5   : > { %v1703_v54 = vadd.f32 %v4115_v0, %v1253_v50  ;;  %v1767_v55 = vadd.f32 %v4115_v0, %v1509_v51  ;;  %v1255_v56 = vpop.f32.mrb[47].mxu0  ;;  %v1511_v57 = vpop.f32.mrb[47].mxu1 }
 0x1c7   : > { %v3022_v58 = vpack.c.bf16 %v1703_v54, %v1702_v52  ;;  %v3182_v59 = vpack.c.bf16 %v1767_v55, %v1766_v53 }
 0x1c9   : > { %3294 = vst [vmem:[%s4126_s27 + $0x58] sm:$0xff] %v3022_v58   ;;  %3326 = vst [vmem:[%s4126_s27 + $0x158] sm:$0xff] %v3182_v59  }
 0x1ca   : > { %v1258_v60 = vpop.f32.mrb[48].mxu0  ;;  %v1514_v61 = vpop.f32.mrb[48].mxu1 }
 0x1cb   : > { %v1260_v62 = vpop.f32.mrb[49].mxu0  ;;  %v1516_v63 = vpop.f32.mrb[49].mxu1  ;;  %v1704_v3 = vadd.f32 %v4115_v0, %v1258_v60  ;;  %v1768_v4 = vadd.f32 %v4115_v0, %v1514_v61 }
 0x1cc   : > { %v1261_v1 = vpop.f32.mrb[50].mxu0  ;;  %v1517_v2 = vpop.f32.mrb[50].mxu1 }
 0x1cd   : > { %v1705_v5 = vadd.f32 %v4115_v0, %v1261_v1  ;;  %v1769_v6 = vadd.f32 %v4115_v0, %v1517_v2  ;;  %v1263_v7 = vpop.f32.mrb[51].mxu0  ;;  %v1519_v8 = vpop.f32.mrb[51].mxu1 }
 0x1cf   : > { %v3027_v9 = vpack.c.bf16 %v1705_v5, %v1704_v3  ;;  %v3187_v10 = vpack.c.bf16 %v1769_v6, %v1768_v4 }
 0x1d1   : > { %3295 = vst [vmem:[%s4126_s27 + $0x60] sm:$0xff] %v3027_v9   ;;  %3327 = vst [vmem:[%s4126_s27 + $0x160] sm:$0xff] %v3187_v10  }
 0x1d2   : > { %v1266_v11 = vpop.f32.mrb[52].mxu0  ;;  %v1522_v12 = vpop.f32.mrb[52].mxu1 }
 0x1d3   : > { %v1268_v13 = vpop.f32.mrb[53].mxu0  ;;  %v1524_v14 = vpop.f32.mrb[53].mxu1  ;;  %v1706_v17 = vadd.f32 %v4115_v0, %v1266_v11  ;;  %v1770_v18 = vadd.f32 %v4115_v0, %v1522_v12 }
 0x1d4   : > { %v1269_v15 = vpop.f32.mrb[54].mxu0  ;;  %v1525_v16 = vpop.f32.mrb[54].mxu1 }
 0x1d5   : > { %v1707_v19 = vadd.f32 %v4115_v0, %v1269_v15  ;;  %v1771_v20 = vadd.f32 %v4115_v0, %v1525_v16  ;;  %v1271_v21 = vpop.f32.mrb[55].mxu0  ;;  %v1527_v22 = vpop.f32.mrb[55].mxu1 }
 0x1d7   : > { %v3032_v23 = vpack.c.bf16 %v1707_v19, %v1706_v17  ;;  %v3192_v24 = vpack.c.bf16 %v1771_v20, %v1770_v18 }
 0x1d9   : > { %3296 = vst [vmem:[%s4126_s27 + $0x68] sm:$0xff] %v3032_v23   ;;  %3328 = vst [vmem:[%s4126_s27 + $0x168] sm:$0xff] %v3192_v24  }
 0x1da   : > { %v1274_v25 = vpop.f32.mrb[56].mxu0  ;;  %v1530_v26 = vpop.f32.mrb[56].mxu1 }
 0x1db   : > { %v1276_v27 = vpop.f32.mrb[57].mxu0  ;;  %v1532_v28 = vpop.f32.mrb[57].mxu1  ;;  %v1708_v31 = vadd.f32 %v4115_v0, %v1274_v25  ;;  %v1772_v32 = vadd.f32 %v4115_v0, %v1530_v26 }
 0x1dc   : > { %v1277_v29 = vpop.f32.mrb[58].mxu0  ;;  %v1533_v30 = vpop.f32.mrb[58].mxu1 }
 0x1dd   : > { %v1709_v33 = vadd.f32 %v4115_v0, %v1277_v29  ;;  %v1773_v34 = vadd.f32 %v4115_v0, %v1533_v30  ;;  %v1279_v35 = vpop.f32.mrb[59].mxu0  ;;  %v1535_v36 = vpop.f32.mrb[59].mxu1 }
 0x1df   : > { %v3037_v37 = vpack.c.bf16 %v1709_v33, %v1708_v31  ;;  %v3197_v38 = vpack.c.bf16 %v1773_v34, %v1772_v32 }
 0x1e1   : > { %3297 = vst [vmem:[%s4126_s27 + $0x70] sm:$0xff] %v3037_v37   ;;  %3329 = vst [vmem:[%s4126_s27 + $0x170] sm:$0xff] %v3197_v38  }
 0x1e2   : > { %v1282_v39 = vpop.f32.mrb[60].mxu0  ;;  %v1538_v40 = vpop.f32.mrb[60].mxu1 }
 0x1e3   : > { %v1284_v41 = vpop.f32.mrb[61].mxu0  ;;  %v1540_v42 = vpop.f32.mrb[61].mxu1  ;;  %v1710_v45 = vadd.f32 %v4115_v0, %v1282_v39  ;;  %v1774_v46 = vadd.f32 %v4115_v0, %v1538_v40 }
 0x1e4   : > { %v1285_v43 = vpop.f32.mrb[62].mxu0  ;;  %v1541_v44 = vpop.f32.mrb[62].mxu1 }
 0x1e5   : > { %v1711_v47 = vadd.f32 %v4115_v0, %v1285_v43  ;;  %v1775_v48 = vadd.f32 %v4115_v0, %v1541_v44  ;;  %v1287_v49 = vpop.f32.mrb[63].mxu0  ;;  %v1543_v50 = vpop.f32.mrb[63].mxu1 }
 0x1e7   : > { %v3042_v51 = vpack.c.bf16 %v1711_v47, %v1710_v45  ;;  %v3202_v52 = vpack.c.bf16 %v1775_v48, %v1774_v46 }
 0x1e9   : > { %3298 = vst [vmem:[%s4126_s27 + $0x78] sm:$0xff] %v3042_v51   ;;  %3330 = vst [vmem:[%s4126_s27 + $0x178] sm:$0xff] %v3202_v52  }
 0x1ea   : > { %v1290_v53 = vpop.f32.mrb[64].mxu0  ;;  %v1546_v54 = vpop.f32.mrb[64].mxu1 }
 0x1eb   : > { %v1292_v55 = vpop.f32.mrb[65].mxu0  ;;  %v1548_v56 = vpop.f32.mrb[65].mxu1  ;;  %v1712_v59 = vadd.f32 %v4115_v0, %v1290_v53  ;;  %v1776_v60 = vadd.f32 %v4115_v0, %v1546_v54 }
 0x1ec   : > { %v1293_v57 = vpop.f32.mrb[66].mxu0  ;;  %v1549_v58 = vpop.f32.mrb[66].mxu1 }
 0x1ed   : > { %v1713_v61 = vadd.f32 %v4115_v0, %v1293_v57  ;;  %v1777_v62 = vadd.f32 %v4115_v0, %v1549_v58  ;;  %v1295_v63 = vpop.f32.mrb[67].mxu0  ;;  %v1551_v1 = vpop.f32.mrb[67].mxu1 }
 0x1ef   : > { %v3047_v2 = vpack.c.bf16 %v1713_v61, %v1712_v59  ;;  %v3207_v3 = vpack.c.bf16 %v1777_v62, %v1776_v60 }
 0x1f1   : > { %3299 = vst [vmem:[%s4126_s27 + $0x80] sm:$0xff] %v3047_v2   ;;  %3331 = vst [vmem:[%s4126_s27 + $0x180] sm:$0xff] %v3207_v3  }
 0x1f2   : > { %v1298_v4 = vpop.f32.mrb[68].mxu0  ;;  %v1554_v5 = vpop.f32.mrb[68].mxu1 }
 0x1f3   : > { %v1300_v6 = vpop.f32.mrb[69].mxu0  ;;  %v1556_v7 = vpop.f32.mrb[69].mxu1  ;;  %v1714_v10 = vadd.f32 %v4115_v0, %v1298_v4  ;;  %v1778_v11 = vadd.f32 %v4115_v0, %v1554_v5 }
 0x1f4   : > { %v1301_v8 = vpop.f32.mrb[70].mxu0  ;;  %v1557_v9 = vpop.f32.mrb[70].mxu1 }
 0x1f5   : > { %v1715_v12 = vadd.f32 %v4115_v0, %v1301_v8  ;;  %v1779_v13 = vadd.f32 %v4115_v0, %v1557_v9  ;;  %v1303_v14 = vpop.f32.mrb[71].mxu0  ;;  %v1559_v15 = vpop.f32.mrb[71].mxu1 }
 0x1f7   : > { %v3052_v16 = vpack.c.bf16 %v1715_v12, %v1714_v10  ;;  %v3212_v17 = vpack.c.bf16 %v1779_v13, %v1778_v11 }
 0x1f9   : > { %3300 = vst [vmem:[%s4126_s27 + $0x88] sm:$0xff] %v3052_v16   ;;  %3332 = vst [vmem:[%s4126_s27 + $0x188] sm:$0xff] %v3212_v17  }
 0x1fa   : > { %v1306_v18 = vpop.f32.mrb[72].mxu0  ;;  %v1562_v19 = vpop.f32.mrb[72].mxu1 }
 0x1fb   : > { %v1308_v20 = vpop.f32.mrb[73].mxu0  ;;  %v1564_v21 = vpop.f32.mrb[73].mxu1  ;;  %v1716_v24 = vadd.f32 %v4115_v0, %v1306_v18  ;;  %v1780_v25 = vadd.f32 %v4115_v0, %v1562_v19 }
 0x1fc   : > { %v1309_v22 = vpop.f32.mrb[74].mxu0  ;;  %v1565_v23 = vpop.f32.mrb[74].mxu1 }
 0x1fd   : > { %v1717_v26 = vadd.f32 %v4115_v0, %v1309_v22  ;;  %v1781_v27 = vadd.f32 %v4115_v0, %v1565_v23  ;;  %v1311_v28 = vpop.f32.mrb[75].mxu0  ;;  %v1567_v29 = vpop.f32.mrb[75].mxu1 }
 0x1ff   : > { %v3057_v30 = vpack.c.bf16 %v1717_v26, %v1716_v24  ;;  %v3217_v31 = vpack.c.bf16 %v1781_v27, %v1780_v25 }
 0x201   : > { %3301 = vst [vmem:[%s4126_s27 + $0x90] sm:$0xff] %v3057_v30   ;;  %3333 = vst [vmem:[%s4126_s27 + $0x190] sm:$0xff] %v3217_v31  }
 0x202   : > { %v1314_v32 = vpop.f32.mrb[76].mxu0  ;;  %v1570_v33 = vpop.f32.mrb[76].mxu1 }
 0x203   : > { %v1316_v34 = vpop.f32.mrb[77].mxu0  ;;  %v1572_v35 = vpop.f32.mrb[77].mxu1  ;;  %v1718_v38 = vadd.f32 %v4115_v0, %v1314_v32  ;;  %v1782_v39 = vadd.f32 %v4115_v0, %v1570_v33 }
 0x204   : > { %v1317_v36 = vpop.f32.mrb[78].mxu0  ;;  %v1573_v37 = vpop.f32.mrb[78].mxu1 }
 0x205   : > { %v1719_v40 = vadd.f32 %v4115_v0, %v1317_v36  ;;  %v1783_v41 = vadd.f32 %v4115_v0, %v1573_v37  ;;  %v1319_v42 = vpop.f32.mrb[79].mxu0  ;;  %v1575_v43 = vpop.f32.mrb[79].mxu1 }
 0x207   : > { %v3062_v44 = vpack.c.bf16 %v1719_v40, %v1718_v38  ;;  %v3222_v45 = vpack.c.bf16 %v1783_v41, %v1782_v39 }
 0x209   : > { %3302 = vst [vmem:[%s4126_s27 + $0x98] sm:$0xff] %v3062_v44   ;;  %3334 = vst [vmem:[%s4126_s27 + $0x198] sm:$0xff] %v3222_v45  }
 0x20a   : > { %v1322_v46 = vpop.f32.mrb[80].mxu0  ;;  %v1578_v47 = vpop.f32.mrb[80].mxu1 }
 0x20b   : > { %v1324_v48 = vpop.f32.mrb[81].mxu0  ;;  %v1580_v49 = vpop.f32.mrb[81].mxu1  ;;  %v1720_v52 = vadd.f32 %v4115_v0, %v1322_v46  ;;  %v1784_v53 = vadd.f32 %v4115_v0, %v1578_v47 }
 0x20c   : > { %v1325_v50 = vpop.f32.mrb[82].mxu0  ;;  %v1581_v51 = vpop.f32.mrb[82].mxu1 }
 0x20d   : > { %v1721_v54 = vadd.f32 %v4115_v0, %v1325_v50  ;;  %v1785_v55 = vadd.f32 %v4115_v0, %v1581_v51  ;;  %v1327_v56 = vpop.f32.mrb[83].mxu0  ;;  %v1583_v57 = vpop.f32.mrb[83].mxu1 }
 0x20f   : > { %v3067_v58 = vpack.c.bf16 %v1721_v54, %v1720_v52  ;;  %v3227_v59 = vpack.c.bf16 %v1785_v55, %v1784_v53 }
 0x211   : > { %3303 = vst [vmem:[%s4126_s27 + $0xa0] sm:$0xff] %v3067_v58   ;;  %3335 = vst [vmem:[%s4126_s27 + $0x1a0] sm:$0xff] %v3227_v59  }
 0x212   : > { %v1330_v60 = vpop.f32.mrb[84].mxu0  ;;  %v1586_v61 = vpop.f32.mrb[84].mxu1 }
 0x213   : > { %v1332_v62 = vpop.f32.mrb[85].mxu0  ;;  %v1588_v63 = vpop.f32.mrb[85].mxu1  ;;  %v1722_v3 = vadd.f32 %v4115_v0, %v1330_v60  ;;  %v1786_v4 = vadd.f32 %v4115_v0, %v1586_v61 }
 0x214   : > { %v1333_v1 = vpop.f32.mrb[86].mxu0  ;;  %v1589_v2 = vpop.f32.mrb[86].mxu1 }
 0x215   : > { %v1723_v5 = vadd.f32 %v4115_v0, %v1333_v1  ;;  %v1787_v6 = vadd.f32 %v4115_v0, %v1589_v2  ;;  %v1335_v7 = vpop.f32.mrb[87].mxu0  ;;  %v1591_v8 = vpop.f32.mrb[87].mxu1 }
 0x217   : > { %v3072_v9 = vpack.c.bf16 %v1723_v5, %v1722_v3  ;;  %v3232_v10 = vpack.c.bf16 %v1787_v6, %v1786_v4 }
 0x219   : > { %3304 = vst [vmem:[%s4126_s27 + $0xa8] sm:$0xff] %v3072_v9   ;;  %3336 = vst [vmem:[%s4126_s27 + $0x1a8] sm:$0xff] %v3232_v10  }
 0x21a   : > { %v1338_v11 = vpop.f32.mrb[88].mxu0  ;;  %v1594_v12 = vpop.f32.mrb[88].mxu1 }
 0x21b   : > { %v1340_v13 = vpop.f32.mrb[89].mxu0  ;;  %v1596_v14 = vpop.f32.mrb[89].mxu1  ;;  %v1724_v17 = vadd.f32 %v4115_v0, %v1338_v11  ;;  %v1788_v18 = vadd.f32 %v4115_v0, %v1594_v12 }
 0x21c   : > { %v1341_v15 = vpop.f32.mrb[90].mxu0  ;;  %v1597_v16 = vpop.f32.mrb[90].mxu1 }
 0x21d   : > { %v1725_v19 = vadd.f32 %v4115_v0, %v1341_v15  ;;  %v1789_v20 = vadd.f32 %v4115_v0, %v1597_v16  ;;  %v1343_v21 = vpop.f32.mrb[91].mxu0  ;;  %v1599_v22 = vpop.f32.mrb[91].mxu1 }
 0x21f   : > { %v3077_v23 = vpack.c.bf16 %v1725_v19, %v1724_v17  ;;  %v3237_v24 = vpack.c.bf16 %v1789_v20, %v1788_v18 }
 0x221   : > { %3305 = vst [vmem:[%s4126_s27 + $0xb0] sm:$0xff] %v3077_v23   ;;  %3337 = vst [vmem:[%s4126_s27 + $0x1b0] sm:$0xff] %v3237_v24  }
 0x222   : > { %v1346_v25 = vpop.f32.mrb[92].mxu0  ;;  %v1602_v26 = vpop.f32.mrb[92].mxu1 }
 0x223   : > { %v1348_v27 = vpop.f32.mrb[93].mxu0  ;;  %v1604_v28 = vpop.f32.mrb[93].mxu1  ;;  %v1726_v31 = vadd.f32 %v4115_v0, %v1346_v25  ;;  %v1790_v32 = vadd.f32 %v4115_v0, %v1602_v26 }
 0x224   : > { %v1349_v29 = vpop.f32.mrb[94].mxu0  ;;  %v1605_v30 = vpop.f32.mrb[94].mxu1 }
 0x225   : > { %v1727_v33 = vadd.f32 %v4115_v0, %v1349_v29  ;;  %v1791_v34 = vadd.f32 %v4115_v0, %v1605_v30  ;;  %v1351_v35 = vpop.f32.mrb[95].mxu0  ;;  %v1607_v36 = vpop.f32.mrb[95].mxu1 }
 0x227   : > { %v3082_v37 = vpack.c.bf16 %v1727_v33, %v1726_v31  ;;  %v3242_v38 = vpack.c.bf16 %v1791_v34, %v1790_v32 }
 0x229   : > { %3306 = vst [vmem:[%s4126_s27 + $0xb8] sm:$0xff] %v3082_v37   ;;  %3338 = vst [vmem:[%s4126_s27 + $0x1b8] sm:$0xff] %v3242_v38  }
 0x22a   : > { %v1354_v39 = vpop.f32.mrb[96].mxu0  ;;  %v1610_v40 = vpop.f32.mrb[96].mxu1 }
 0x22b   : > { %v1356_v41 = vpop.f32.mrb[97].mxu0  ;;  %v1612_v42 = vpop.f32.mrb[97].mxu1  ;;  %v1728_v45 = vadd.f32 %v4115_v0, %v1354_v39  ;;  %v1792_v46 = vadd.f32 %v4115_v0, %v1610_v40 }
 0x22c   : > { %v1357_v43 = vpop.f32.mrb[98].mxu0  ;;  %v1613_v44 = vpop.f32.mrb[98].mxu1 }
 0x22d   : > { %v1729_v47 = vadd.f32 %v4115_v0, %v1357_v43  ;;  %v1793_v48 = vadd.f32 %v4115_v0, %v1613_v44  ;;  %v1359_v49 = vpop.f32.mrb[99].mxu0  ;;  %v1615_v50 = vpop.f32.mrb[99].mxu1 }
 0x22f   : > { %v3087_v51 = vpack.c.bf16 %v1729_v47, %v1728_v45  ;;  %v3247_v52 = vpack.c.bf16 %v1793_v48, %v1792_v46 }
 0x231   : > { %3307 = vst [vmem:[%s4126_s27 + $0xc0] sm:$0xff] %v3087_v51   ;;  %3339 = vst [vmem:[%s4126_s27 + $0x1c0] sm:$0xff] %v3247_v52  }
 0x232   : > { %v1362_v53 = vpop.f32.mrb[100].mxu0  ;;  %v1618_v54 = vpop.f32.mrb[100].mxu1 }
 0x233   : > { %v1364_v55 = vpop.f32.mrb[101].mxu0  ;;  %v1620_v56 = vpop.f32.mrb[101].mxu1  ;;  %v1730_v59 = vadd.f32 %v4115_v0, %v1362_v53  ;;  %v1794_v60 = vadd.f32 %v4115_v0, %v1618_v54 }
 0x234   : > { %v1365_v57 = vpop.f32.mrb[102].mxu0  ;;  %v1621_v58 = vpop.f32.mrb[102].mxu1 }
 0x235   : > { %v1731_v61 = vadd.f32 %v4115_v0, %v1365_v57  ;;  %v1795_v62 = vadd.f32 %v4115_v0, %v1621_v58  ;;  %v1367_v63 = vpop.f32.mrb[103].mxu0  ;;  %v1623_v1 = vpop.f32.mrb[103].mxu1 }
 0x237   : > { %v3092_v2 = vpack.c.bf16 %v1731_v61, %v1730_v59  ;;  %v3252_v3 = vpack.c.bf16 %v1795_v62, %v1794_v60 }
 0x239   : > { %3308 = vst [vmem:[%s4126_s27 + $0xc8] sm:$0xff] %v3092_v2   ;;  %3340 = vst [vmem:[%s4126_s27 + $0x1c8] sm:$0xff] %v3252_v3   ;;  %v3651_v3 = vld [vmem:[%s4379_s3] ss:$0 sm:$0xff] }
 0x23a   : > { %v1370_v4 = vpop.f32.mrb[104].mxu0  ;;  %v1626_v5 = vpop.f32.mrb[104].mxu1 }
 0x23b   : > { %v1372_v6 = vpop.f32.mrb[105].mxu0  ;;  %v1628_v7 = vpop.f32.mrb[105].mxu1  ;;  %v1732_v10 = vadd.f32 %v4115_v0, %v1370_v4  ;;  %v1796_v11 = vadd.f32 %v4115_v0, %v1626_v5 }
 0x23c   : > { %v1373_v8 = vpop.f32.mrb[106].mxu0  ;;  %v1629_v9 = vpop.f32.mrb[106].mxu1 }
 0x23d   : > { %v1733_v12 = vadd.f32 %v4115_v0, %v1373_v8  ;;  %v1797_v13 = vadd.f32 %v4115_v0, %v1629_v9  ;;  %v1375_v14 = vpop.f32.mrb[107].mxu0  ;;  %v1631_v15 = vpop.f32.mrb[107].mxu1 }
 0x23f   : > { %v3097_v16 = vpack.c.bf16 %v1733_v12, %v1732_v10  ;;  %v3257_v17 = vpack.c.bf16 %v1797_v13, %v1796_v11 }
 0x241   : > { %3309 = vst [vmem:[%s4126_s27 + $0xd0] sm:$0xff] %v3097_v16   ;;  %3341 = vst [vmem:[%s4126_s27 + $0x1d0] sm:$0xff] %v3257_v17  }
 0x242   : > { %v1378_v18 = vpop.f32.mrb[108].mxu0  ;;  %v1634_v19 = vpop.f32.mrb[108].mxu1 }
 0x243   : > { %v1380_v20 = vpop.f32.mrb[109].mxu0  ;;  %v1636_v21 = vpop.f32.mrb[109].mxu1  ;;  %v1734_v24 = vadd.f32 %v4115_v0, %v1378_v18  ;;  %v1798_v25 = vadd.f32 %v4115_v0, %v1634_v19 }
 0x244   : > { %v1381_v22 = vpop.f32.mrb[110].mxu0  ;;  %v1637_v23 = vpop.f32.mrb[110].mxu1 }
 0x245   : > { %v1735_v26 = vadd.f32 %v4115_v0, %v1381_v22  ;;  %v1799_v27 = vadd.f32 %v4115_v0, %v1637_v23  ;;  %v1383_v28 = vpop.f32.mrb[111].mxu0  ;;  %v1639_v29 = vpop.f32.mrb[111].mxu1 }
 0x247   : > { %v3102_v30 = vpack.c.bf16 %v1735_v26, %v1734_v24  ;;  %v3262_v31 = vpack.c.bf16 %v1799_v27, %v1798_v25 }
 0x249   : > { %3310 = vst [vmem:[%s4126_s27 + $0xd8] sm:$0xff] %v3102_v30   ;;  %3342 = vst [vmem:[%s4126_s27 + $0x1d8] sm:$0xff] %v3262_v31  }
 0x24a   : > { %v1386_v32 = vpop.f32.mrb[112].mxu0  ;;  %v1642_v33 = vpop.f32.mrb[112].mxu1 }
 0x24b   : > { %v1388_v34 = vpop.f32.mrb[113].mxu0  ;;  %v1644_v35 = vpop.f32.mrb[113].mxu1  ;;  %v1736_v38 = vadd.f32 %v4115_v0, %v1386_v32  ;;  %v1800_v39 = vadd.f32 %v4115_v0, %v1642_v33 }
 0x24c   : > { %v1389_v36 = vpop.f32.mrb[114].mxu0  ;;  %v1645_v37 = vpop.f32.mrb[114].mxu1 }
 0x24d   : > { %v1737_v40 = vadd.f32 %v4115_v0, %v1389_v36  ;;  %v1801_v41 = vadd.f32 %v4115_v0, %v1645_v37  ;;  %v1391_v42 = vpop.f32.mrb[115].mxu0  ;;  %v1647_v43 = vpop.f32.mrb[115].mxu1 }
 0x24f   : > { %v3107_v44 = vpack.c.bf16 %v1737_v40, %v1736_v38  ;;  %v3267_v45 = vpack.c.bf16 %v1801_v41, %v1800_v39 }
 0x251   : > { %3311 = vst [vmem:[%s4126_s27 + $0xe0] sm:$0xff] %v3107_v44   ;;  %3343 = vst [vmem:[%s4126_s27 + $0x1e0] sm:$0xff] %v3267_v45  }
 0x252   : > { %v1394_v46 = vpop.f32.mrb[116].mxu0  ;;  %v1650_v47 = vpop.f32.mrb[116].mxu1 }
 0x253   : > { %v1396_v48 = vpop.f32.mrb[117].mxu0  ;;  %v1652_v49 = vpop.f32.mrb[117].mxu1  ;;  %v1738_v52 = vadd.f32 %v4115_v0, %v1394_v46  ;;  %v1802_v53 = vadd.f32 %v4115_v0, %v1650_v47 }
 0x254   : > { %v1397_v50 = vpop.f32.mrb[118].mxu0  ;;  %v1653_v51 = vpop.f32.mrb[118].mxu1 }
 0x255   : > { %v1739_v54 = vadd.f32 %v4115_v0, %v1397_v50  ;;  %v1803_v55 = vadd.f32 %v4115_v0, %v1653_v51  ;;  %v1399_v56 = vpop.f32.mrb[119].mxu0  ;;  %v1655_v57 = vpop.f32.mrb[119].mxu1 }
 0x257   : > { %v3112_v58 = vpack.c.bf16 %v1739_v54, %v1738_v52  ;;  %v3272_v59 = vpack.c.bf16 %v1803_v55, %v1802_v53 }
 0x259   : > { %3312 = vst [vmem:[%s4126_s27 + $0xe8] sm:$0xff] %v3112_v58   ;;  %3344 = vst [vmem:[%s4126_s27 + $0x1e8] sm:$0xff] %v3272_v59  }
 0x25a   : > { %v1402_v60 = vpop.f32.mrb[120].mxu0  ;;  %v1658_v61 = vpop.f32.mrb[120].mxu1 }
 0x25b   : > { %v1404_v62 = vpop.f32.mrb[121].mxu0  ;;  %v1660_v63 = vpop.f32.mrb[121].mxu1  ;;  %v1740_v0 = vadd.f32 %v3651_v3, %v1402_v60  ;;  %v1804_v4 = vadd.f32 %v3651_v3, %v1658_v61 }
 0x25c   : > { %v1405_v1 = vpop.f32.mrb[122].mxu0  ;;  %v1661_v2 = vpop.f32.mrb[122].mxu1 }
 0x25d   : > { %v1741_v5 = vadd.f32 %v3651_v3, %v1405_v1  ;;  %v1805_v6 = vadd.f32 %v3651_v3, %v1661_v2  ;;  %v1407_v7 = vpop.f32.mrb[123].mxu0  ;;  %v1663_v8 = vpop.f32.mrb[123].mxu1 }
 0x25f   : > { %v3117_v9 = vpack.c.bf16 %v1741_v5, %v1740_v0  ;;  %v3277_v10 = vpack.c.bf16 %v1805_v6, %v1804_v4 }
 0x261   : > { %3313 = vst [vmem:[%s4126_s27 + $0xf0] sm:$0xff] %v3117_v9   ;;  %3345 = vst [vmem:[%s4126_s27 + $0x1f0] sm:$0xff] %v3277_v10  }
 0x262   : > { %v1410_v11 = vpop.f32.mrb[124].mxu0  ;;  %v1666_v12 = vpop.f32.mrb[124].mxu1 }
 0x263   : > { %v1412_v13 = vpop.f32.mrb[125].mxu0  ;;  %v1668_v14 = vpop.f32.mrb[125].mxu1  ;;  %v1742_v17 = vadd.f32 %v3651_v3, %v1410_v11  ;;  %v1806_v18 = vadd.f32 %v3651_v3, %v1666_v12 }
 0x264   : > { %v1413_v15 = vpop.f32.mrb[126].mxu0  ;;  %v1669_v16 = vpop.f32.mrb[126].mxu1 }
 0x265   : > { %v1743_v19 = vadd.f32 %v3651_v3, %v1413_v15  ;;  %v1807_v20 = vadd.f32 %v3651_v3, %v1669_v16  ;;  %v1415_v21 = vpop.f32.mrb[127].mxu0  ;;  %v1671_v22 = vpop.f32.mrb[127].mxu1 }
 0x267   : > { %v3122_v23 = vpack.c.bf16 %v1743_v19, %v1742_v17  ;;  %v3282_v24 = vpack.c.bf16 %v1807_v20, %v1806_v18 }
 0x269   : > { %3314 = vst [vmem:[%s4126_s27 + $0xf8] sm:$0xff] %v3122_v23   ;;  %3346 = vst [vmem:[%s4126_s27 + $0x1f8] sm:$0xff] %v3282_v24  }
 0x26a   : > { %3723 = shalt.err (!%p3720_p7)
}
 0x26b   : > { %s3724_s11 = scalar_lea.hbm %s4328_s5, 8192  ;;  %s3728_s22 = scalar_lea.hbm %s4380_s4, 16384 }
 0x26c   : > { %p3725_p9 = scmp.ne.s32.totalorder %s4328_s5, %s3724_s11  ;;  %p3729_p5 = scmp.lt.u32.totalorder %s4328_s5, %s4380_s4 }
 0x26d   : > { %p3730_p11 = scmp.lt.u32.totalorder %s3728_s22, %s3724_s11  ;;  %p3732_p4 = scmp.lt.u32.totalorder %s3724_s11, %s4328_s5 }
 0x26e   : > { %p3726_p2 = pnand %p3725_p9, %p3908_p12 }
 0x26f   : > { %p3731_p1 = por %p3730_p11, %p3729_p5 }
 0x270   : > { %p3727_p0 = pneg %p3726_p2 }
 0x271   : > { %p3733_p6 = por %p3732_p4, %p3731_p1 }
 0x273   : > { %p3734_p8 = pnand %p3733_p6, %p3727_p0 }
 0x275   : > { %3737 = shalt.err (!%p3734_p8)
}
 0x276   : > { %s3790_s28 = smov 64   ;;  %s3791_s8 = smov 4  }
 0x277   : > { %3385 = dma.vmem_to_hbm [thread:$0]  (%p3908_p12), %s4330_s14, 8192, %s4328_s5, %s2449_s2, %s3790_s28, %s3790_s28, %s3791_s8  }
 0x278 PF: > { %s2477_s13 = sand.u32 1, %s3768_s15   ;;  %p4395_p10 = scmp.ne.s32.totalorder %s4385_s21, 0 }
 0x279   : > { %p4396_p13 = scmp.ge.s32.totalorder %s3780_s18, 2  ;;  %s2478_s29 = scalar_lea.sflag [#allocation4], %s2477_s13 }
 0x27b   : > { %p3396_p3 = pnand %p4396_p13, %p4395_p10 }
 0x27d   : > { %3763 = dma.done.wait (!%p3396_p3), %s2478_s29, 8192  }
 0x27e   : > { %3765 = vsyncadd (!%p3396_p3), %s2478_s29, 4294959104  ;;  %p18_p7 = scmp.ge.s32.totalorder %s3873_s26, 4   ;;  %s4397_s15 = smov %s3772_s16 }
 0x27f   : > { %s4398_s16 = smov %s3776_s17  ;;  %s4399_s17 = smov %s3904_s19 }
 0x280   : > { %s4400_s18 = smov %s3873_s26  ;;  %20 = sbr.rel (!%p18_p7) target bundleno = 6 (0x6), region = 85 }
 0x287   :  { %2483 = vsyncpa [#allocation3], 1 }
 0x288   :  { %2485 = vsyncpa [#allocation3 + $0x1], 1 }
 0x289   :  { %2486 = vsyncpa [#allocation6], 1 }
 0x28a   :  { %2487 = vsyncpa [#allocation4], 1 }
 0x28b   :  { %2489 = vsyncpa [#allocation4 + $0x1], 1 }

</bundles_post_ra>
